<compile_context>
chip_gen: v6e
topology: v6e:2x2x1
jax: 0.10.0
libtpu: 0.0.40
codegen_flags: <defaults>
</compile_context>

<pallas_src>
import functools

import jax
import jax.numpy as jnp
import numpy as np
from jax import lax
from jax.experimental import pallas as pl
from jax.experimental.pallas import tpu as pltpu

_MIB = 1024 * 1024


# ----------------------------- per-generation heuristics -----------------------------
def _device_kind():
    try:
        return jax.devices()[0].device_kind.lower()
    except Exception:
        return ""


def _vmem_budget_bytes(kind):
    # v7x: 64 MiB physical VMEM -> stay well under; v4/v5e/v6e: 128 MiB physical but
    # 16/32 MiB scoped defaults -> raise explicitly.  Unknown -> conservative.
    if "v7" in kind or "7x" in kind:
        return 48 * _MIB
    if any(t in kind for t in ("v4", "v5", "v6")):
        return 96 * _MIB
    return 32 * _MIB


def _default_softmax_dtype(kind):
    # bf16 exp/elementwise on v6e/v7x (bf16 VPU+EUP); keep f32 on v5e and older.
    if any(t in kind for t in ("v2", "v3", "v4", "v5")):
        return jnp.float32
    return jnp.bfloat16


def _pick_block_q(T, d_model, n_head, d_k, d_v, *, budget_bytes, return_attn,
                  attn_bytes, cdt_bytes):
    """Largest clean divisor of T whose per-step VMEM estimate fits the budget."""
    d_kv = n_head * (d_k + d_v)
    w_bytes = (d_model * n_head * d_k + d_model * d_kv + n_head * d_v * d_model) * cdt_bytes
    b_bytes = (n_head * d_k + d_kv + d_model) * 4
    fixed = 2 * T * d_model * 4            # x block (double-buffered across batches)
    fixed += T * d_kv * cdt_bytes          # persistent K/V scratch
    fixed += 2 * (w_bytes + b_bytes)       # weights/biases (worst case: double-buffered)
    candidates = [c for c in (1024, 512, 256, 128, 64, 32, 16, 8) if c <= T and T % c == 0]
    if not candidates:
        candidates = [T]                   # VMEM hazard for long odd T; see review notes
    for bq in candidates:
        per = 2 * bq * d_model * 4                    # output block
        per += 4 * bq * T * 4                         # scores / softmax temporaries (f32)
        if return_attn:
            per += 2 * n_head * bq * T * attn_bytes   # attn output block (worst case 2 bufs)
        if fixed + per <= 0.8 * budget_bytes:
            return bq
    return candidates[-1]


# ----------------------------- fused per-(batch, q-tile) kernel -----------------------------
def _mha_kernel(x_ref, wq_ref, bq_ref, wkv_ref, bkv_ref, wfc_ref, bfc_ref, *rest,
                n_head, d_k, d_v, block_q, compute_dtype, softmax_dtype, return_attn):
    if return_attn:
        out_ref, attn_ref, kv_ref = rest
    else:
        out_ref, kv_ref = rest
        attn_ref = None

    cdt = compute_dtype
    qi = pl.program_id(1)

    # ---- K/V projection: once per batch (qi == 0), reused by every query tile ----
    @pl.when(qi == 0)
    def _():
        x_full = x_ref[0]                                           # (T, d_model) f32
        kv = jnp.dot(x_full.astype(cdt), wkv_ref[...],
                     preferred_element_type=jnp.float32) + bkv_ref[...]
        kv_ref[...] = kv.astype(cdt)

    # ---- query/residual rows for this tile: sliced from the already-resident x block ----
    q_start = pl.multiple_of(qi * block_q, block_q)
    x_q = x_ref[0, pl.ds(q_start, block_q), :]                      # (block_q, d_model) f32

    # Q projection (1/temperature already folded into wq/bq by the wrapper).
    q_all = jnp.dot(x_q.astype(cdt), wq_ref[...],
                    preferred_element_type=jnp.float32) + bq_ref[...]   # (block_q, H*d_k)

    kv_all = kv_ref[...]                                            # (T, H*(d_k+d_v)) cdt
    v_off = n_head * d_k

    # fc bias + residual form the f32 accumulator; per-head contexts are folded into it
    # through per-head row-slices of w_fc (no 16-lane concat of contexts needed).
    out_acc = x_q + bfc_ref[...]                                    # (block_q, d_model) f32

    for h in range(n_head):                                         # n_head is small & static
        q_h = q_all[:, h * d_k:(h + 1) * d_k].astype(cdt)           # (block_q, d_k)
        k_h = kv_all[:, h * d_k:(h + 1) * d_k]                      # (T, d_k)
        v_h = kv_all[:, v_off + h * d_v: v_off + (h + 1) * d_v]     # (T, d_v)

        # scores = q_h @ k_h.T (scale folded into q), f32 MXU accumulation.
        s = lax.dot_general(q_h, k_h, (((1,), (1,)), ((), ())),
                            preferred_element_type=jnp.float32)     # (block_q, T)

        # Numerically-stable softmax over the key axis (torch Softmax(dim=2)):
        # f32 max-subtraction, exp/elementwise in softmax_dtype (bf16 on v6e/v7x),
        # row sums in f32, reciprocal on the EUP.
        s = s - jnp.max(s, axis=-1, keepdims=True)
        e = jnp.exp(s.astype(softmax_dtype))
        denom = jnp.sum(e, axis=-1, dtype=jnp.float32, keepdims=True)
        r = pl.reciprocal(denom, approx=True)                       # (block_q, 1) f32

        if attn_ref is not None:
            # NOTE: approx reciprocal -> stored rows sum to 1 only to ~EUP precision.
            attn_ref[h, 0] = (e.astype(jnp.float32) * r).astype(attn_ref.dtype)

        # Fast-path normalization: scale the (block_q, d_v) context instead of the
        # (block_q, T) probabilities (T/d_v fewer VPU multiplies).
        ctx = jnp.dot(e.astype(cdt), v_h, preferred_element_type=jnp.float32)
        ctx = (ctx * r).astype(cdt)                                  # (block_q, d_v)
        wfc_h = wfc_ref[h * d_v:(h + 1) * d_v, :]                    # (d_v, d_model)
        out_acc = out_acc + jnp.dot(ctx, wfc_h, preferred_element_type=jnp.float32)

    # TODO(synk): if the deployed d_model is < 128 (toy sizes only), the store below lowers
    #             to masked partial stores; pad the feature dim to 128 in the wrapper there.
    out_ref[0] = out_acc.astype(out_ref.dtype)


# ----------------------------- wrapper -----------------------------
def multi_head_attention(x, params, *, n_head, d_k, d_v,
                         compute_dtype=jnp.bfloat16, softmax_dtype=None,
                         return_attn=True, attn_dtype=jnp.float32, block_q=None):
    """x: (B, T, d_model) float32.  Returns (output (B,T,d_model), attn (n_head*B,T,T)) when
    return_attn=True, otherwise (output, None).

    compute_dtype: MXU input dtype. bf16 runs at full MXU rate on ALL of v5e/v6e/v7x
    (f32 matmul is multi-pass emulation), accumulation is f32.
    softmax_dtype=None: auto (bf16 exp/elementwise on v6e/v7x, f32 on v5e and older).
    attn_dtype=jnp.bfloat16 halves the dominant O(H*B*T^2) attention write-back traffic.
    """
    B, T, d_model = x.shape
    inv_temp = 1.0 / float(np.power(d_model, 0.5))

    kind = _device_kind()
    budget = _vmem_budget_bytes(kind)
    if softmax_dtype is None:
        softmax_dtype = _default_softmax_dtype(kind)
    cdt_bytes = jnp.dtype(compute_dtype).itemsize
    attn_bytes = jnp.dtype(attn_dtype).itemsize

    if block_q is None:
        block_q = _pick_block_q(T, d_model, n_head, d_k, d_v, budget_bytes=budget,
                                return_attn=return_attn, attn_bytes=attn_bytes,
                                cdt_bytes=cdt_bytes)
    assert T % block_q == 0, "block_q must divide T"
    num_q_tiles = T // block_q

    # Fold 1/temperature into the Q projection; fuse K|V weights; cast weights once.
    wq = (params["w_qs"] * inv_temp).astype(compute_dtype)                      # (d_model, H*d_k)
    bq = (params["b_qs"] * inv_temp).reshape(1, n_head * d_k).astype(jnp.float32)
    wkv = jnp.concatenate([params["w_ks"], params["w_vs"]], axis=1).astype(compute_dtype)
    bkv = jnp.concatenate([params["b_ks"], params["b_vs"]]).reshape(1, -1).astype(jnp.float32)
    wfc = params["w_fc"].astype(compute_dtype)                                  # (H*d_v, d_model)
    bfc = params["b_fc"].reshape(1, d_model).astype(jnp.float32)

    kernel = functools.partial(_mha_kernel, n_head=n_head, d_k=d_k, d_v=d_v,
                               block_q=block_q, compute_dtype=compute_dtype,
                               softmax_dtype=softmax_dtype, return_attn=return_attn)

    def build(single_buffer):
        def const_spec(shape):
            # Weights/biases never change across grid steps -> second buffer is wasted VMEM.
            if single_buffer:
                return pl.BlockSpec(shape, lambda b, qi: (0, 0), pipeline_mode=pl.Buffered(1))
            return pl.BlockSpec(shape, lambda b, qi: (0, 0))

        out_shapes = [jax.ShapeDtypeStruct((B, T, d_model), jnp.float32)]
        out_specs = [pl.BlockSpec((1, block_q, d_model), lambda b, qi: (b, qi, 0))]
        if return_attn:
            # Head-major attn buffer: reshape(n_head*B, T, T) is the exact PyTorch layout.
            out_shapes.append(jax.ShapeDtypeStruct((n_head, B, T, T), attn_dtype))
            if single_buffer:
                # Write-only & sequential -> single-buffered halves its VMEM footprint.
                out_specs.append(pl.BlockSpec((n_head, 1, block_q, T),
                                              lambda b, qi: (0, b, qi, 0),
                                              pipeline_mode=pl.Buffered(1)))
            else:
                out_specs.append(pl.BlockSpec((n_head, 1, block_q, T),
                                              lambda b, qi: (0, b, qi, 0)))

        return pl.pallas_call(
            kernel,
            out_shape=tuple(out_shapes),
            grid_spec=pltpu.PrefetchScalarGridSpec(
                num_scalar_prefetch=0,
                grid=(B, num_q_tiles),
                in_specs=[
                    # x passed ONCE: full-T rows per batch (K/V) + in-kernel slice for queries.
                    pl.BlockSpec((1, T, d_model), lambda b, qi: (b, 0, 0)),
                    const_spec((d_model, n_head * d_k)),           # wq (pre-scaled)
                    const_spec((1, n_head * d_k)),                 # bq
                    const_spec((d_model, n_head * (d_k + d_v))),   # w_kv
                    const_spec((1, n_head * (d_k + d_v))),         # b_kv
                    const_spec((n_head * d_v, d_model)),           # w_fc
                    const_spec((1, d_model)),                      # b_fc
                ],
                out_specs=tuple(out_specs),
                scratch_shapes=[pltpu.VMEM((T, n_head * (d_k + d_v)), compute_dtype)],
            ),
            compiler_params=pltpu.CompilerParams(
                # K/V scratch computed at qi==0 and reused -> qi must be sequential;
                # batch stays "parallel" so v7x megacore still shards over it.
                dimension_semantics=("parallel", "arbitrary"),
                vmem_limit_bytes=budget),
        )

    args = (x, wq, bq, wkv, bkv, wfc, bfc)
    if hasattr(pl, "Buffered"):
        try:
            results = build(True)(*args)
        except Exception:   # pipeline_mode=Buffered not supported -> default double-buffering
            results = build(False)(*args)
    else:
        results = build(False)(*args)

    if return_attn:
        out, attn = results
        return out, attn.reshape(n_head * B, T, T)
    (out,) = results
    return out, None


# ----------------------------- pure-JAX reference (correctness check) -----------------------------
def _reference(x, params, *, n_head, d_k, d_v):
    B, T, d_model = x.shape
    temperature = np.power(d_model, 0.5)
    q = (x @ params["w_qs"] + params["b_qs"]).reshape(B, T, n_head, d_k)
    k = (x @ params["w_ks"] + params["b_ks"]).reshape(B, T, n_head, d_k)
    v = (x @ params["w_vs"] + params["b_vs"]).reshape(B, T, n_head, d_v)
    q = q.transpose(2, 0, 1, 3).reshape(-1, T, d_k)
    k = k.transpose(2, 0, 1, 3).reshape(-1, T, d_k)
    v = v.transpose(2, 0, 1, 3).reshape(-1, T, d_v)
    attn = jnp.einsum("btd,bsd->bts", q, k) / temperature
    attn = jax.nn.softmax(attn, axis=2)
    out = jnp.einsum("bts,bsd->btd", attn, v)
    out = out.reshape(n_head, B, T, d_v).transpose(1, 2, 0, 3).reshape(B, T, -1)
    out = out @ params["w_fc"] + params["b_fc"] + x
    return out, attn


if __name__ == "__main__":
    # Small shapes consistent with the module
    B, T, d_model = 2, 8, 32
    n_head, d_k, d_v = 2, 16, 16

    key = jax.random.PRNGKey(0)
    keys = jax.random.split(key, 10)
    scale = 0.1
    params = {
        "w_qs": scale * jax.random.normal(keys[0], (d_model, n_head * d_k), jnp.float32),
        "b_qs": scale * jax.random.normal(keys[1], (n_head * d_k,), jnp.float32),
        "w_ks": scale * jax.random.normal(keys[2], (d_model, n_head * d_k), jnp.float32),
        "b_ks": scale * jax.random.normal(keys[3], (n_head * d_k,), jnp.float32),
        "w_vs": scale * jax.random.normal(keys[4], (d_model, n_head * d_v), jnp.float32),
        "b_vs": scale * jax.random.normal(keys[5], (n_head * d_v,), jnp.float32),
        "w_fc": scale * jax.random.normal(keys[6], (n_head * d_v, d_model), jnp.float32),
        "b_fc": scale * jax.random.normal(keys[7], (d_model,), jnp.float32),
    }
    x = jax.random.normal(keys[8], (B, T, d_model), jnp.float32)

    # Full path (matches the PyTorch forward: returns output and attention weights).
    out, attn = multi_head_attention(x, params, n_head=n_head, d_k=d_k, d_v=d_v,
                                     return_attn=True)
    out = jax.block_until_ready(out)
    attn = jax.block_until_ready(attn)

    # Fast path (no O(T^2) attn write-back) -- just exercise it.
    out_fast, _ = multi_head_attention(x, params, n_head=n_head, d_k=d_k, d_v=d_v,
                                       return_attn=False)
    out_fast = jax.block_until_ready(out_fast)

    out_ref, attn_ref = _reference(x, params, n_head=n_head, d_k=d_k, d_v=d_v)
    # bf16 MXU inputs + (possibly) bf16 softmax + approx reciprocal -> loosened tolerances.
    np.testing.assert_allclose(np.asarray(out), np.asarray(out_ref), rtol=2e-2, atol=2e-2)
    np.testing.assert_allclose(np.asarray(attn), np.asarray(attn_ref), rtol=2e-2, atol=2e-2)
    np.testing.assert_allclose(np.asarray(out_fast), np.asarray(out_ref), rtol=2e-2, atol=2e-2)

    print("KERNEL_OK")
</pallas_src>

<mosaic_0001>
module attributes {stable_mosaic.version = 11 : i64} {
  func.func @_mha_kernel(%arg0: i32, %arg1: i32, %arg2: memref<1x8x32xf32, #tpu.memory_space<vmem>>, %arg3: memref<32x32xbf16, #tpu.memory_space<vmem>>, %arg4: memref<1x32xf32, #tpu.memory_space<vmem>>, %arg5: memref<32x64xbf16, #tpu.memory_space<vmem>>, %arg6: memref<1x64xf32, #tpu.memory_space<vmem>>, %arg7: memref<32x32xbf16, #tpu.memory_space<vmem>>, %arg8: memref<1x32xf32, #tpu.memory_space<vmem>>, %arg9: memref<1x8x32xf32, #tpu.memory_space<vmem>>, %arg10: memref<2x1x8x8xf32, #tpu.memory_space<vmem>>, %arg11: memref<8x64xbf16, #tpu.memory_space<vmem>>) attributes {dimension_semantics = [#tpu.dimension_semantics<parallel>, #tpu.dimension_semantics<arbitrary>], iteration_bounds = array<i64: 2, 1>, scalar_prefetch = 0 : i64, scratch_operands = 1 : i64, tpu.core_type = #tpu.core_type<tc>, window_params = [{transform_indices = @transform_0, window_bounds = array<i64: 1, 8, 32>}, {pipeline_mode = #tpu.pipeline_mode<synchronous>, transform_indices = @transform_1, window_bounds = array<i64: 32, 32>}, {pipeline_mode = #tpu.pipeline_mode<synchronous>, transform_indices = @transform_2, window_bounds = array<i64: 1, 32>}, {pipeline_mode = #tpu.pipeline_mode<synchronous>, transform_indices = @transform_3, window_bounds = array<i64: 32, 64>}, {pipeline_mode = #tpu.pipeline_mode<synchronous>, transform_indices = @transform_4, window_bounds = array<i64: 1, 64>}, {pipeline_mode = #tpu.pipeline_mode<synchronous>, transform_indices = @transform_5, window_bounds = array<i64: 32, 32>}, {pipeline_mode = #tpu.pipeline_mode<synchronous>, transform_indices = @transform_6, window_bounds = array<i64: 1, 32>}, {transform_indices = @transform_7, window_bounds = array<i64: 1, 8, 32>}, {pipeline_mode = #tpu.pipeline_mode<synchronous>, transform_indices = @transform_8, window_bounds = array<i64: 2, 1, 8, 8>}]} {
    %c0_i32 = arith.constant 0 : i32
    %0 = arith.cmpi eq, %arg1, %c0_i32 : i32
    %1 = arith.extui %0 : i1 to i32
    %c0_i32_0 = arith.constant 0 : i32
    %2 = arith.cmpi ne, %1, %c0_i32_0 : i32
    scf.if %2 {
      %c0_33 = arith.constant 0 : index
      %c0_34 = arith.constant 0 : index
      %c0_35 = arith.constant 0 : index
      %77 = vector.load %arg2[%c0_33, %c0_34, %c0_35] : memref<1x8x32xf32, #tpu.memory_space<vmem>>, vector<1x8x32xf32>
      %78 = vector.shape_cast %77 : vector<1x8x32xf32> to vector<8x32xf32>
      %79 = arith.truncf %78 : vector<8x32xf32> to vector<8x32xbf16>
      %c0_36 = arith.constant 0 : index
      %c0_37 = arith.constant 0 : index
      %80 = vector.load %arg5[%c0_36, %c0_37] : memref<32x64xbf16, #tpu.memory_space<vmem>>, vector<32x64xbf16>
      %cst_38 = arith.constant dense<0.000000e+00> : vector<8x64xf32>
      %81 = tpu.matmul %79, %80, %cst_38 {dimension_numbers = #tpu.dot_dimension_numbers<[1], [0], [0], [1], [0, 0, 1, 1], [], []>} : vector<8x32xbf16>, vector<32x64xbf16>, vector<8x64xf32> -> vector<8x64xf32>
      %c0_39 = arith.constant 0 : index
      %c0_40 = arith.constant 0 : index
      %82 = vector.load %arg6[%c0_39, %c0_40] : memref<1x64xf32, #tpu.memory_space<vmem>>, vector<1x64xf32>
      %83 = vector.broadcast %82 : vector<1x64xf32> to vector<8x64xf32>
      %84 = arith.addf %81, %83 : vector<8x64xf32>
      %85 = arith.truncf %84 : vector<8x64xf32> to vector<8x64xbf16>
      %c0_41 = arith.constant 0 : index
      %c0_42 = arith.constant 0 : index
      %86 = vector.load %arg11[%c0_41, %c0_42] : memref<8x64xbf16, #tpu.memory_space<vmem>>, vector<8x64xbf16>
      tpu.vector_store %arg11[%c0_41, %c0_42], %85 {strides = array<i32>} : memref<8x64xbf16, #tpu.memory_space<vmem>>, vector<8x64xbf16>,
    } else {
    }
    %c8_i32 = arith.constant 8 : i32
    %3 = arith.muli %arg1, %c8_i32 : i32
    %4 = tpu.assume_multiple %3, 8 : i32
    %c0 = arith.constant 0 : index
    %5 = arith.index_cast %4 : i32 to index
    %c0_1 = arith.constant 0 : index
    %6 = vector.load %arg2[%c0, %5, %c0_1] : memref<1x8x32xf32, #tpu.memory_space<vmem>>, vector<1x8x32xf32>
    %7 = vector.shape_cast %6 : vector<1x8x32xf32> to vector<8x32xf32>
    %8 = arith.truncf %7 : vector<8x32xf32> to vector<8x32xbf16>
    %c0_2 = arith.constant 0 : index
    %c0_3 = arith.constant 0 : index
    %9 = vector.load %arg3[%c0_2, %c0_3] : memref<32x32xbf16, #tpu.memory_space<vmem>>, vector<32x32xbf16>
    %cst = arith.constant dense<0.000000e+00> : vector<8x32xf32>
    %10 = tpu.matmul %8, %9, %cst {dimension_numbers = #tpu.dot_dimension_numbers<[1], [0], [0], [1], [0, 0, 1, 1], [], []>} : vector<8x32xbf16>, vector<32x32xbf16>, vector<8x32xf32> -> vector<8x32xf32>
    %c0_4 = arith.constant 0 : index
    %c0_5 = arith.constant 0 : index
    %11 = vector.load %arg4[%c0_4, %c0_5] : memref<1x32xf32, #tpu.memory_space<vmem>>, vector<1x32xf32>
    %12 = vector.broadcast %11 : vector<1x32xf32> to vector<8x32xf32>
    %13 = arith.addf %10, %12 : vector<8x32xf32>
    %c0_6 = arith.constant 0 : index
    %c0_7 = arith.constant 0 : index
    %14 = vector.load %arg11[%c0_6, %c0_7] : memref<8x64xbf16, #tpu.memory_space<vmem>>, vector<8x64xbf16>
    %c0_8 = arith.constant 0 : index
    %c0_9 = arith.constant 0 : index
    %15 = vector.load %arg8[%c0_8, %c0_9] : memref<1x32xf32, #tpu.memory_space<vmem>>, vector<1x32xf32>
    %16 = vector.broadcast %15 : vector<1x32xf32> to vector<8x32xf32>
    %17 = arith.addf %7, %16 : vector<8x32xf32>
    %18 = vector.extract_strided_slice %13 {offsets = [0, 0], sizes = [8, 16], strides = [1, 1]} : vector<8x32xf32> to vector<8x16xf32>
    %19 = arith.truncf %18 : vector<8x16xf32> to vector<8x16xbf16>
    %20 = vector.extract_strided_slice %14 {offsets = [0, 0], sizes = [8, 16], strides = [1, 1]} : vector<8x64xbf16> to vector<8x16xbf16>
    %21 = vector.extract_strided_slice %14 {offsets = [0, 32], sizes = [8, 16], strides = [1, 1]} : vector<8x64xbf16> to vector<8x16xbf16>
    %cst_10 = arith.constant dense<0.000000e+00> : vector<8x8xf32>
    %22 = tpu.matmul %19, %20, %cst_10 {dimension_numbers = #tpu.dot_dimension_numbers<[1], [1], [0], [0], [0, 0, 1, 0], [], []>} : vector<8x16xbf16>, vector<8x16xbf16>, vector<8x8xf32> -> vector<8x8xf32>
    %cst_11 = arith.constant dense<0xFF800000> : vector<8xf32>
    %23 = vector.multi_reduction <maximumf>, %22, %cst_11 [1] : vector<8x8xf32> to vector<8xf32>
    %24 = vector.shape_cast %23 : vector<8xf32> to vector<8x1xf32>
    %25 = vector.broadcast %24 : vector<8x1xf32> to vector<8x8xf32>
    %26 = arith.subf %22, %25 : vector<8x8xf32>
    %27 = arith.truncf %26 : vector<8x8xf32> to vector<8x8xbf16>
    %28 = math.exp %27 : vector<8x8xbf16>
    %29 = arith.extf %28 : vector<8x8xbf16> to vector<8x8xf32>
    %cst_12 = arith.constant dense<0.000000e+00> : vector<8xf32>
    %30 = vector.multi_reduction <add>, %29, %cst_12 [1] : vector<8x8xf32> to vector<8xf32>
    %31 = vector.shape_cast %30 : vector<8xf32> to vector<8x1xf32>
    %32 = tpu.reciprocal %31 {approx = true} : vector<8x1xf32> -> vector<8x1xf32>
    %33 = arith.extf %28 : vector<8x8xbf16> to vector<8x8xf32>
    %34 = vector.broadcast %32 : vector<8x1xf32> to vector<8x8xf32>
    %35 = arith.mulf %33, %34 : vector<8x8xf32>
    %c0_13 = arith.constant 0 : index
    %c0_14 = arith.constant 0 : index
    %c0_15 = arith.constant 0 : index
    %c0_16 = arith.constant 0 : index
    %36 = vector.load %arg10[%c0_13, %c0_14, %c0_15, %c0_16] : memref<2x1x8x8xf32, #tpu.memory_space<vmem>>, vector<1x1x8x8xf32>
    %37 = vector.shape_cast %36 : vector<1x1x8x8xf32> to vector<8x8xf32>
    %38 = vector.shape_cast %35 : vector<8x8xf32> to vector<1x1x8x8xf32>
    tpu.vector_store %arg10[%c0_13, %c0_14, %c0_15, %c0_16], %38 {strides = array<i32>} : memref<2x1x8x8xf32, #tpu.memory_space<vmem>>, vector<1x1x8x8xf32>,
    %cst_17 = arith.constant dense<0.000000e+00> : vector<8x16xf32>
    %39 = tpu.matmul %28, %21, %cst_17 {dimension_numbers = #tpu.dot_dimension_numbers<[1], [0], [0], [1], [0, 0, 1, 1], [], []>} : vector<8x8xbf16>, vector<8x16xbf16>, vector<8x16xf32> -> vector<8x16xf32>
    %40 = vector.broadcast %32 : vector<8x1xf32> to vector<8x16xf32>
    %41 = arith.mulf %39, %40 : vector<8x16xf32>
    %42 = arith.truncf %41 : vector<8x16xf32> to vector<8x16xbf16>
    %c0_18 = arith.constant 0 : index
    %c0_19 = arith.constant 0 : index
    %43 = vector.load %arg7[%c0_18, %c0_19] : memref<32x32xbf16, #tpu.memory_space<vmem>>, vector<16x32xbf16>
    %cst_20 = arith.constant dense<0.000000e+00> : vector<8x32xf32>
    %44 = tpu.matmul %42, %43, %cst_20 {dimension_numbers = #tpu.dot_dimension_numbers<[1], [0], [0], [1], [0, 0, 1, 1], [], []>} : vector<8x16xbf16>, vector<16x32xbf16>, vector<8x32xf32> -> vector<8x32xf32>
    %45 = arith.addf %17, %44 : vector<8x32xf32>
    %46 = vector.extract_strided_slice %13 {offsets = [0, 16], sizes = [8, 16], strides = [1, 1]} : vector<8x32xf32> to vector<8x16xf32>
    %47 = arith.truncf %46 : vector<8x16xf32> to vector<8x16xbf16>
    %48 = vector.extract_strided_slice %14 {offsets = [0, 16], sizes = [8, 16], strides = [1, 1]} : vector<8x64xbf16> to vector<8x16xbf16>
    %49 = vector.extract_strided_slice %14 {offsets = [0, 48], sizes = [8, 16], strides = [1, 1]} : vector<8x64xbf16> to vector<8x16xbf16>
    %cst_21 = arith.constant dense<0.000000e+00> : vector<8x8xf32>
    %50 = tpu.matmul %47, %48, %cst_21 {dimension_numbers = #tpu.dot_dimension_numbers<[1], [1], [0], [0], [0, 0, 1, 0], [], []>} : vector<8x16xbf16>, vector<8x16xbf16>, vector<8x8xf32> -> vector<8x8xf32>
    %cst_22 = arith.constant dense<0xFF800000> : vector<8xf32>
    %51 = vector.multi_reduction <maximumf>, %50, %cst_22 [1] : vector<8x8xf32> to vector<8xf32>
    %52 = vector.shape_cast %51 : vector<8xf32> to vector<8x1xf32>
    %53 = vector.broadcast %52 : vector<8x1xf32> to vector<8x8xf32>
    %54 = arith.subf %50, %53 : vector<8x8xf32>
    %55 = arith.truncf %54 : vector<8x8xf32> to vector<8x8xbf16>
    %56 = math.exp %55 : vector<8x8xbf16>
    %57 = arith.extf %56 : vector<8x8xbf16> to vector<8x8xf32>
    %cst_23 = arith.constant dense<0.000000e+00> : vector<8xf32>
    %58 = vector.multi_reduction <add>, %57, %cst_23 [1] : vector<8x8xf32> to vector<8xf32>
    %59 = vector.shape_cast %58 : vector<8xf32> to vector<8x1xf32>
    %60 = tpu.reciprocal %59 {approx = true} : vector<8x1xf32> -> vector<8x1xf32>
    %61 = arith.extf %56 : vector<8x8xbf16> to vector<8x8xf32>
    %62 = vector.broadcast %60 : vector<8x1xf32> to vector<8x8xf32>
    %63 = arith.mulf %61, %62 : vector<8x8xf32>
    %c1 = arith.constant 1 : index
    %c0_24 = arith.constant 0 : index
    %c0_25 = arith.constant 0 : index
    %c0_26 = arith.constant 0 : index
    %64 = vector.load %arg10[%c1, %c0_24, %c0_25, %c0_26] : memref<2x1x8x8xf32, #tpu.memory_space<vmem>>, vector<1x1x8x8xf32>
    %65 = vector.shape_cast %64 : vector<1x1x8x8xf32> to vector<8x8xf32>
    %66 = vector.shape_cast %63 : vector<8x8xf32> to vector<1x1x8x8xf32>
    tpu.vector_store %arg10[%c1, %c0_24, %c0_25, %c0_26], %66 {strides = array<i32>} : memref<2x1x8x8xf32, #tpu.memory_space<vmem>>, vector<1x1x8x8xf32>,
    %cst_27 = arith.constant dense<0.000000e+00> : vector<8x16xf32>
    %67 = tpu.matmul %56, %49, %cst_27 {dimension_numbers = #tpu.dot_dimension_numbers<[1], [0], [0], [1], [0, 0, 1, 1], [], []>} : vector<8x8xbf16>, vector<8x16xbf16>, vector<8x16xf32> -> vector<8x16xf32>
    %68 = vector.broadcast %60 : vector<8x1xf32> to vector<8x16xf32>
    %69 = arith.mulf %67, %68 : vector<8x16xf32>
    %70 = arith.truncf %69 : vector<8x16xf32> to vector<8x16xbf16>
    %c16 = arith.constant 16 : index
    %c0_28 = arith.constant 0 : index
    %71 = vector.load %arg7[%c16, %c0_28] : memref<32x32xbf16, #tpu.memory_space<vmem>>, vector<16x32xbf16>
    %cst_29 = arith.constant dense<0.000000e+00> : vector<8x32xf32>
    %72 = tpu.matmul %70, %71, %cst_29 {dimension_numbers = #tpu.dot_dimension_numbers<[1], [0], [0], [1], [0, 0, 1, 1], [], []>} : vector<8x16xbf16>, vector<16x32xbf16>, vector<8x32xf32> -> vector<8x32xf32>
    %73 = arith.addf %45, %72 : vector<8x32xf32>
    %c0_30 = arith.constant 0 : index
    %c0_31 = arith.constant 0 : index
    %c0_32 = arith.constant 0 : index
    %74 = vector.load %arg9[%c0_30, %c0_31, %c0_32] : memref<1x8x32xf32, #tpu.memory_space<vmem>>, vector<1x8x32xf32>
    %75 = vector.shape_cast %74 : vector<1x8x32xf32> to vector<8x32xf32>
    %76 = vector.shape_cast %73 : vector<8x32xf32> to vector<1x8x32xf32>
    tpu.vector_store %arg9[%c0_30, %c0_31, %c0_32], %76 {strides = array<i32>} : memref<1x8x32xf32, #tpu.memory_space<vmem>>, vector<1x8x32xf32>,
    return
  }
  func.func @transform_0(%arg0: i32, %arg1: i32) -> (i32, i32, i32) {
    %c0_i32 = arith.constant 0 : i32
    %c0_i32_0 = arith.constant 0 : i32
    %c0_i32_1 = arith.constant 0 : i32
    return %arg0, %c0_i32, %c0_i32_0 : i32, i32, i32
  }
  func.func @transform_1(%arg0: i32, %arg1: i32) -> (i32, i32) {
    %c0_i32 = arith.constant 0 : i32
    %c0_i32_0 = arith.constant 0 : i32
    %c0_i32_1 = arith.constant 0 : i32
    return %c0_i32, %c0_i32_0 : i32, i32
  }
  func.func @transform_2(%arg0: i32, %arg1: i32) -> (i32, i32) {
    %c0_i32 = arith.constant 0 : i32
    %c0_i32_0 = arith.constant 0 : i32
    %c0_i32_1 = arith.constant 0 : i32
    return %c0_i32, %c0_i32_0 : i32, i32
  }
  func.func @transform_3(%arg0: i32, %arg1: i32) -> (i32, i32) {
    %c0_i32 = arith.constant 0 : i32
    %c0_i32_0 = arith.constant 0 : i32
    %c0_i32_1 = arith.constant 0 : i32
    return %c0_i32, %c0_i32_0 : i32, i32
  }
  func.func @transform_4(%arg0: i32, %arg1: i32) -> (i32, i32) {
    %c0_i32 = arith.constant 0 : i32
    %c0_i32_0 = arith.constant 0 : i32
    %c0_i32_1 = arith.constant 0 : i32
    return %c0_i32, %c0_i32_0 : i32, i32
  }
  func.func @transform_5(%arg0: i32, %arg1: i32) -> (i32, i32) {
    %c0_i32 = arith.constant 0 : i32
    %c0_i32_0 = arith.constant 0 : i32
    %c0_i32_1 = arith.constant 0 : i32
    return %c0_i32, %c0_i32_0 : i32, i32
  }
  func.func @transform_6(%arg0: i32, %arg1: i32) -> (i32, i32) {
    %c0_i32 = arith.constant 0 : i32
    %c0_i32_0 = arith.constant 0 : i32
    %c0_i32_1 = arith.constant 0 : i32
    return %c0_i32, %c0_i32_0 : i32, i32
  }
  func.func @transform_7(%arg0: i32, %arg1: i32) -> (i32, i32, i32) {
    %c0_i32 = arith.constant 0 : i32
    %c0_i32_0 = arith.constant 0 : i32
    return %arg0, %arg1, %c0_i32 : i32, i32, i32
  }
  func.func @transform_8(%arg0: i32, %arg1: i32) -> (i32, i32, i32, i32) {
    %c0_i32 = arith.constant 0 : i32
    %c0_i32_0 = arith.constant 0 : i32
    %c0_i32_1 = arith.constant 0 : i32
    return %c0_i32, %arg0, %arg1, %c0_i32_0 : i32, i32, i32, i32
  }
}

module attributes {stable_mosaic.version = 11 : i64} {
  func.func @_mha_kernel(%arg0: i32, %arg1: i32, %arg2: memref<1x8x32xf32, #tpu.memory_space<vmem>>, %arg3: memref<32x32xbf16, #tpu.memory_space<vmem>>, %arg4: memref<1x32xf32, #tpu.memory_space<vmem>>, %arg5: memref<32x64xbf16, #tpu.memory_space<vmem>>, %arg6: memref<1x64xf32, #tpu.memory_space<vmem>>, %arg7: memref<32x32xbf16, #tpu.memory_space<vmem>>, %arg8: memref<1x32xf32, #tpu.memory_space<vmem>>, %arg9: memref<1x8x32xf32, #tpu.memory_space<vmem>>, %arg10: memref<2x1x8x8xf32, #tpu.memory_space<vmem>>, %arg11: memref<8x64xbf16, #tpu.memory_space<vmem>>) attributes {dimension_semantics = [#tpu.dimension_semantics<parallel>, #tpu.dimension_semantics<arbitrary>], iteration_bounds = array<i64: 2, 1>, scalar_prefetch = 0 : i64, scratch_operands = 1 : i64, tpu.core_type = #tpu.core_type<tc>, window_params = [{transform_indices = @transform_0, window_bounds = array<i64: 1, 8, 32>}, {pipeline_mode = #tpu.pipeline_mode<synchronous>, transform_indices = @transform_1, window_bounds = array<i64: 32, 32>}, {pipeline_mode = #tpu.pipeline_mode<synchronous>, transform_indices = @transform_2, window_bounds = array<i64: 1, 32>}, {pipeline_mode = #tpu.pipeline_mode<synchronous>, transform_indices = @transform_3, window_bounds = array<i64: 32, 64>}, {pipeline_mode = #tpu.pipeline_mode<synchronous>, transform_indices = @transform_4, window_bounds = array<i64: 1, 64>}, {pipeline_mode = #tpu.pipeline_mode<synchronous>, transform_indices = @transform_5, window_bounds = array<i64: 32, 32>}, {pipeline_mode = #tpu.pipeline_mode<synchronous>, transform_indices = @transform_6, window_bounds = array<i64: 1, 32>}, {transform_indices = @transform_7, window_bounds = array<i64: 1, 8, 32>}, {transform_indices = @transform_8, window_bounds = array<i64: 2, 1, 8, 8>}]} {
    %c0_i32 = arith.constant 0 : i32
    %0 = arith.cmpi eq, %arg1, %c0_i32 : i32
    %1 = arith.extui %0 : i1 to i32
    %c0_i32_0 = arith.constant 0 : i32
    %2 = arith.cmpi ne, %1, %c0_i32_0 : i32
    scf.if %2 {
      %c0_33 = arith.constant 0 : index
      %c0_34 = arith.constant 0 : index
      %c0_35 = arith.constant 0 : index
      %77 = vector.load %arg2[%c0_33, %c0_34, %c0_35] : memref<1x8x32xf32, #tpu.memory_space<vmem>>, vector<1x8x32xf32>
      %78 = vector.shape_cast %77 : vector<1x8x32xf32> to vector<8x32xf32>
      %79 = arith.truncf %78 : vector<8x32xf32> to vector<8x32xbf16>
      %c0_36 = arith.constant 0 : index
      %c0_37 = arith.constant 0 : index
      %80 = vector.load %arg5[%c0_36, %c0_37] : memref<32x64xbf16, #tpu.memory_space<vmem>>, vector<32x64xbf16>
      %cst_38 = arith.constant dense<0.000000e+00> : vector<8x64xf32>
      %81 = tpu.matmul %79, %80, %cst_38 {dimension_numbers = #tpu.dot_dimension_numbers<[1], [0], [0], [1], [0, 0, 1, 1], [], []>} : vector<8x32xbf16>, vector<32x64xbf16>, vector<8x64xf32> -> vector<8x64xf32>
      %c0_39 = arith.constant 0 : index
      %c0_40 = arith.constant 0 : index
      %82 = vector.load %arg6[%c0_39, %c0_40] : memref<1x64xf32, #tpu.memory_space<vmem>>, vector<1x64xf32>
      %83 = vector.broadcast %82 : vector<1x64xf32> to vector<8x64xf32>
      %84 = arith.addf %81, %83 : vector<8x64xf32>
      %85 = arith.truncf %84 : vector<8x64xf32> to vector<8x64xbf16>
      %c0_41 = arith.constant 0 : index
      %c0_42 = arith.constant 0 : index
      %86 = vector.load %arg11[%c0_41, %c0_42] : memref<8x64xbf16, #tpu.memory_space<vmem>>, vector<8x64xbf16>
      tpu.vector_store %arg11[%c0_41, %c0_42], %85 {strides = array<i32>} : memref<8x64xbf16, #tpu.memory_space<vmem>>, vector<8x64xbf16>,
    } else {
    }
    %c8_i32 = arith.constant 8 : i32
    %3 = arith.muli %arg1, %c8_i32 : i32
    %4 = tpu.assume_multiple %3, 8 : i32
    %c0 = arith.constant 0 : index
    %5 = arith.index_cast %4 : i32 to index
    %c0_1 = arith.constant 0 : index
    %6 = vector.load %arg2[%c0, %5, %c0_1] : memref<1x8x32xf32, #tpu.memory_space<vmem>>, vector<1x8x32xf32>
    %7 = vector.shape_cast %6 : vector<1x8x32xf32> to vector<8x32xf32>
    %8 = arith.truncf %7 : vector<8x32xf32> to vector<8x32xbf16>
    %c0_2 = arith.constant 0 : index
    %c0_3 = arith.constant 0 : index
    %9 = vector.load %arg3[%c0_2, %c0_3] : memref<32x32xbf16, #tpu.memory_space<vmem>>, vector<32x32xbf16>
    %cst = arith.constant dense<0.000000e+00> : vector<8x32xf32>
    %10 = tpu.matmul %8, %9, %cst {dimension_numbers = #tpu.dot_dimension_numbers<[1], [0], [0], [1], [0, 0, 1, 1], [], []>} : vector<8x32xbf16>, vector<32x32xbf16>, vector<8x32xf32> -> vector<8x32xf32>
    %c0_4 = arith.constant 0 : index
    %c0_5 = arith.constant 0 : index
    %11 = vector.load %arg4[%c0_4, %c0_5] : memref<1x32xf32, #tpu.memory_space<vmem>>, vector<1x32xf32>
    %12 = vector.broadcast %11 : vector<1x32xf32> to vector<8x32xf32>
    %13 = arith.addf %10, %12 : vector<8x32xf32>
    %c0_6 = arith.constant 0 : index
    %c0_7 = arith.constant 0 : index
    %14 = vector.load %arg11[%c0_6, %c0_7] : memref<8x64xbf16, #tpu.memory_space<vmem>>, vector<8x64xbf16>
    %c0_8 = arith.constant 0 : index
    %c0_9 = arith.constant 0 : index
    %15 = vector.load %arg8[%c0_8, %c0_9] : memref<1x32xf32, #tpu.memory_space<vmem>>, vector<1x32xf32>
    %16 = vector.broadcast %15 : vector<1x32xf32> to vector<8x32xf32>
    %17 = arith.addf %7, %16 : vector<8x32xf32>
    %18 = vector.extract_strided_slice %13 {offsets = [0, 0], sizes = [8, 16], strides = [1, 1]} : vector<8x32xf32> to vector<8x16xf32>
    %19 = arith.truncf %18 : vector<8x16xf32> to vector<8x16xbf16>
    %20 = vector.extract_strided_slice %14 {offsets = [0, 0], sizes = [8, 16], strides = [1, 1]} : vector<8x64xbf16> to vector<8x16xbf16>
    %21 = vector.extract_strided_slice %14 {offsets = [0, 32], sizes = [8, 16], strides = [1, 1]} : vector<8x64xbf16> to vector<8x16xbf16>
    %cst_10 = arith.constant dense<0.000000e+00> : vector<8x8xf32>
    %22 = tpu.matmul %19, %20, %cst_10 {dimension_numbers = #tpu.dot_dimension_numbers<[1], [1], [0], [0], [0, 0, 1, 0], [], []>} : vector<8x16xbf16>, vector<8x16xbf16>, vector<8x8xf32> -> vector<8x8xf32>
    %cst_11 = arith.constant dense<0xFF800000> : vector<8xf32>
    %23 = vector.multi_reduction <maximumf>, %22, %cst_11 [1] : vector<8x8xf32> to vector<8xf32>
    %24 = vector.shape_cast %23 : vector<8xf32> to vector<8x1xf32>
    %25 = vector.broadcast %24 : vector<8x1xf32> to vector<8x8xf32>
    %26 = arith.subf %22, %25 : vector<8x8xf32>
    %27 = arith.truncf %26 : vector<8x8xf32> to vector<8x8xbf16>
    %28 = math.exp %27 : vector<8x8xbf16>
    %29 = arith.extf %28 : vector<8x8xbf16> to vector<8x8xf32>
    %cst_12 = arith.constant dense<0.000000e+00> : vector<8xf32>
    %30 = vector.multi_reduction <add>, %29, %cst_12 [1] : vector<8x8xf32> to vector<8xf32>
    %31 = vector.shape_cast %30 : vector<8xf32> to vector<8x1xf32>
    %32 = tpu.reciprocal %31 {approx = true} : vector<8x1xf32> -> vector<8x1xf32>
    %33 = arith.extf %28 : vector<8x8xbf16> to vector<8x8xf32>
    %34 = vector.broadcast %32 : vector<8x1xf32> to vector<8x8xf32>
    %35 = arith.mulf %33, %34 : vector<8x8xf32>
    %c0_13 = arith.constant 0 : index
    %c0_14 = arith.constant 0 : index
    %c0_15 = arith.constant 0 : index
    %c0_16 = arith.constant 0 : index
    %36 = vector.load %arg10[%c0_13, %c0_14, %c0_15, %c0_16] : memref<2x1x8x8xf32, #tpu.memory_space<vmem>>, vector<1x1x8x8xf32>
    %37 = vector.shape_cast %36 : vector<1x1x8x8xf32> to vector<8x8xf32>
    %38 = vector.shape_cast %35 : vector<8x8xf32> to vector<1x1x8x8xf32>
    tpu.vector_store %arg10[%c0_13, %c0_14, %c0_15, %c0_16], %38 {strides = array<i32>} : memref<2x1x8x8xf32, #tpu.memory_space<vmem>>, vector<1x1x8x8xf32>,
    %cst_17 = arith.constant dense<0.000000e+00> : vector<8x16xf32>
    %39 = tpu.matmul %28, %21, %cst_17 {dimension_numbers = #tpu.dot_dimension_numbers<[1], [0], [0], [1], [0, 0, 1, 1], [], []>} : vector<8x8xbf16>, vector<8x16xbf16>, vector<8x16xf32> -> vector<8x16xf32>
    %40 = vector.broadcast %32 : vector<8x1xf32> to vector<8x16xf32>
    %41 = arith.mulf %39, %40 : vector<8x16xf32>
    %42 = arith.truncf %41 : vector<8x16xf32> to vector<8x16xbf16>
    %c0_18 = arith.constant 0 : index
    %c0_19 = arith.constant 0 : index
    %43 = vector.load %arg7[%c0_18, %c0_19] : memref<32x32xbf16, #tpu.memory_space<vmem>>, vector<16x32xbf16>
    %cst_20 = arith.constant dense<0.000000e+00> : vector<8x32xf32>
    %44 = tpu.matmul %42, %43, %cst_20 {dimension_numbers = #tpu.dot_dimension_numbers<[1], [0], [0], [1], [0, 0, 1, 1], [], []>} : vector<8x16xbf16>, vector<16x32xbf16>, vector<8x32xf32> -> vector<8x32xf32>
    %45 = arith.addf %17, %44 : vector<8x32xf32>
    %46 = vector.extract_strided_slice %13 {offsets = [0, 16], sizes = [8, 16], strides = [1, 1]} : vector<8x32xf32> to vector<8x16xf32>
    %47 = arith.truncf %46 : vector<8x16xf32> to vector<8x16xbf16>
    %48 = vector.extract_strided_slice %14 {offsets = [0, 16], sizes = [8, 16], strides = [1, 1]} : vector<8x64xbf16> to vector<8x16xbf16>
    %49 = vector.extract_strided_slice %14 {offsets = [0, 48], sizes = [8, 16], strides = [1, 1]} : vector<8x64xbf16> to vector<8x16xbf16>
    %cst_21 = arith.constant dense<0.000000e+00> : vector<8x8xf32>
    %50 = tpu.matmul %47, %48, %cst_21 {dimension_numbers = #tpu.dot_dimension_numbers<[1], [1], [0], [0], [0, 0, 1, 0], [], []>} : vector<8x16xbf16>, vector<8x16xbf16>, vector<8x8xf32> -> vector<8x8xf32>
    %cst_22 = arith.constant dense<0xFF800000> : vector<8xf32>
    %51 = vector.multi_reduction <maximumf>, %50, %cst_22 [1] : vector<8x8xf32> to vector<8xf32>
    %52 = vector.shape_cast %51 : vector<8xf32> to vector<8x1xf32>
    %53 = vector.broadcast %52 : vector<8x1xf32> to vector<8x8xf32>
    %54 = arith.subf %50, %53 : vector<8x8xf32>
    %55 = arith.truncf %54 : vector<8x8xf32> to vector<8x8xbf16>
    %56 = math.exp %55 : vector<8x8xbf16>
    %57 = arith.extf %56 : vector<8x8xbf16> to vector<8x8xf32>
    %cst_23 = arith.constant dense<0.000000e+00> : vector<8xf32>
    %58 = vector.multi_reduction <add>, %57, %cst_23 [1] : vector<8x8xf32> to vector<8xf32>
    %59 = vector.shape_cast %58 : vector<8xf32> to vector<8x1xf32>
    %60 = tpu.reciprocal %59 {approx = true} : vector<8x1xf32> -> vector<8x1xf32>
    %61 = arith.extf %56 : vector<8x8xbf16> to vector<8x8xf32>
    %62 = vector.broadcast %60 : vector<8x1xf32> to vector<8x8xf32>
    %63 = arith.mulf %61, %62 : vector<8x8xf32>
    %c1 = arith.constant 1 : index
    %c0_24 = arith.constant 0 : index
    %c0_25 = arith.constant 0 : index
    %c0_26 = arith.constant 0 : index
    %64 = vector.load %arg10[%c1, %c0_24, %c0_25, %c0_26] : memref<2x1x8x8xf32, #tpu.memory_space<vmem>>, vector<1x1x8x8xf32>
    %65 = vector.shape_cast %64 : vector<1x1x8x8xf32> to vector<8x8xf32>
    %66 = vector.shape_cast %63 : vector<8x8xf32> to vector<1x1x8x8xf32>
    tpu.vector_store %arg10[%c1, %c0_24, %c0_25, %c0_26], %66 {strides = array<i32>} : memref<2x1x8x8xf32, #tpu.memory_space<vmem>>, vector<1x1x8x8xf32>,
    %cst_27 = arith.constant dense<0.000000e+00> : vector<8x16xf32>
    %67 = tpu.matmul %56, %49, %cst_27 {dimension_numbers = #tpu.dot_dimension_numbers<[1], [0], [0], [1], [0, 0, 1, 1], [], []>} : vector<8x8xbf16>, vector<8x16xbf16>, vector<8x16xf32> -> vector<8x16xf32>
    %68 = vector.broadcast %60 : vector<8x1xf32> to vector<8x16xf32>
    %69 = arith.mulf %67, %68 : vector<8x16xf32>
    %70 = arith.truncf %69 : vector<8x16xf32> to vector<8x16xbf16>
    %c16 = arith.constant 16 : index
    %c0_28 = arith.constant 0 : index
    %71 = vector.load %arg7[%c16, %c0_28] : memref<32x32xbf16, #tpu.memory_space<vmem>>, vector<16x32xbf16>
    %cst_29 = arith.constant dense<0.000000e+00> : vector<8x32xf32>
    %72 = tpu.matmul %70, %71, %cst_29 {dimension_numbers = #tpu.dot_dimension_numbers<[1], [0], [0], [1], [0, 0, 1, 1], [], []>} : vector<8x16xbf16>, vector<16x32xbf16>, vector<8x32xf32> -> vector<8x32xf32>
    %73 = arith.addf %45, %72 : vector<8x32xf32>
    %c0_30 = arith.constant 0 : index
    %c0_31 = arith.constant 0 : index
    %c0_32 = arith.constant 0 : index
    %74 = vector.load %arg9[%c0_30, %c0_31, %c0_32] : memref<1x8x32xf32, #tpu.memory_space<vmem>>, vector<1x8x32xf32>
    %75 = vector.shape_cast %74 : vector<1x8x32xf32> to vector<8x32xf32>
    %76 = vector.shape_cast %73 : vector<8x32xf32> to vector<1x8x32xf32>
    tpu.vector_store %arg9[%c0_30, %c0_31, %c0_32], %76 {strides = array<i32>} : memref<1x8x32xf32, #tpu.memory_space<vmem>>, vector<1x8x32xf32>,
    return
  }
  func.func @transform_0(%arg0: i32, %arg1: i32) -> (i32, i32, i32) {
    %c0_i32 = arith.constant 0 : i32
    %c0_i32_0 = arith.constant 0 : i32
    %c0_i32_1 = arith.constant 0 : i32
    return %arg0, %c0_i32, %c0_i32_0 : i32, i32, i32
  }
  func.func @transform_1(%arg0: i32, %arg1: i32) -> (i32, i32) {
    %c0_i32 = arith.constant 0 : i32
    %c0_i32_0 = arith.constant 0 : i32
    %c0_i32_1 = arith.constant 0 : i32
    return %c0_i32, %c0_i32_0 : i32, i32
  }
  func.func @transform_2(%arg0: i32, %arg1: i32) -> (i32, i32) {
    %c0_i32 = arith.constant 0 : i32
    %c0_i32_0 = arith.constant 0 : i32
    %c0_i32_1 = arith.constant 0 : i32
    return %c0_i32, %c0_i32_0 : i32, i32
  }
  func.func @transform_3(%arg0: i32, %arg1: i32) -> (i32, i32) {
    %c0_i32 = arith.constant 0 : i32
    %c0_i32_0 = arith.constant 0 : i32
    %c0_i32_1 = arith.constant 0 : i32
    return %c0_i32, %c0_i32_0 : i32, i32
  }
  func.func @transform_4(%arg0: i32, %arg1: i32) -> (i32, i32) {
    %c0_i32 = arith.constant 0 : i32
    %c0_i32_0 = arith.constant 0 : i32
    %c0_i32_1 = arith.constant 0 : i32
    return %c0_i32, %c0_i32_0 : i32, i32
  }
  func.func @transform_5(%arg0: i32, %arg1: i32) -> (i32, i32) {
    %c0_i32 = arith.constant 0 : i32
    %c0_i32_0 = arith.constant 0 : i32
    %c0_i32_1 = arith.constant 0 : i32
    return %c0_i32, %c0_i32_0 : i32, i32
  }
  func.func @transform_6(%arg0: i32, %arg1: i32) -> (i32, i32) {
    %c0_i32 = arith.constant 0 : i32
    %c0_i32_0 = arith.constant 0 : i32
    %c0_i32_1 = arith.constant 0 : i32
    return %c0_i32, %c0_i32_0 : i32, i32
  }
  func.func @transform_7(%arg0: i32, %arg1: i32) -> (i32, i32, i32) {
    %c0_i32 = arith.constant 0 : i32
    %c0_i32_0 = arith.constant 0 : i32
    return %arg0, %arg1, %c0_i32 : i32, i32, i32
  }
  func.func @transform_8(%arg0: i32, %arg1: i32) -> (i32, i32, i32, i32) {
    %c0_i32 = arith.constant 0 : i32
    %c0_i32_0 = arith.constant 0 : i32
    %c0_i32_1 = arith.constant 0 : i32
    return %c0_i32, %arg0, %arg1, %c0_i32_0 : i32, i32, i32, i32
  }
}

</mosaic_0001>

<bundles_post_ra>
// kernel: tpu_custom_call.1
= control target key start
LH: loop header
LB: loop body
LE: loop exit
PB: predicated region body
PF: predicated region fallthrough
CT: control target
= control target key end

     0   :  { %s1843_s0 = inlined_call_operand.hbm [shape: f32[2,8,32], index: 0, kind: input, shape index: {}]   ;;  %s1844_s1 = inlined_call_operand.hbm [shape: bf16[32,32], index: 1, kind: input, shape index: {}]   ;;  %s1845_s2 = inlined_call_operand.vmem [shape: f32[1,32], index: 2, kind: input, shape index: {}]   ;;  %s1846_s3 = inlined_call_operand.hbm [shape: bf16[32,64], index: 3, kind: input, shape index: {}]   ;;  %s1847_s4 = inlined_call_operand.vmem [shape: f32[1,64], index: 4, kind: input, shape index: {}]   ;;  %s1848_s5 = inlined_call_operand.hbm [shape: bf16[32,32], index: 5, kind: input, shape index: {}]   ;;  %s1849_s6 = inlined_call_operand.vmem [shape: f32[1,32], index: 6, kind: input, shape index: {}]   ;;  %s1850_s7 = inlined_call_operand.hbm [shape: f32[2,8,32], index: 7, kind: output, shape index: {0}]   ;;  %s1851_s8 = inlined_call_operand.hbm [shape: f32[2,2,8,8], index: 8, kind: output, shape index: {1}]  }
   0x1   :  { %1857 = sst [smem:[#allocation20_spill]] %s1844_s1 }
   0x2   :  { %1858 = sst [smem:[#allocation21_spill]] %s1846_s3 }
   0x3   :  { %1859 = sst [smem:[#allocation22_spill]] %s1848_s5 }
   0x4   :  { %14 = vsyncpa [#allocation4], 0 }
   0x5   :  { %16 = vsyncpa [#allocation4 + $0x1], 0 }
   0x6   :  { %17 = vsyncpa [#allocation7], 0 }
   0x7   :  { %18 = vsyncpa [#allocation10], 0 }
   0x8   :  { %19 = vsyncpa [#allocation5], 0 }
   0x9   :  { %21 = vsyncpa [#allocation5 + $0x1], 0 }
   0xa   :  { %22 = vsyncpa [#allocation13], 0  ;;  %s1553_s27 = smov 0   ;;  %s1555_s28 = smov 0  }
   0xb   :  { %s1557_s29 = smov 0   ;;  %s1559_s30 = smov 0  }
   0xc   :  { %s1561_s9 = smov 0   ;;  %s1563_s10 = smov 0  }
   0xd LB: > { %s1037_s11 = sadd.s32 4294967295, %s1490_s10   ;;  %s1038_s12 = sadd.s32 4294967294, %s1490_s10   ;;  %s1490_s10 = sphi %s1563_s10, %s28_s10   ;;  %s1486_s9 = sphi %s1561_s9, %s1882_s9   ;;  %s1482_s30 = sphi %s1559_s30, %s1881_s30   ;;  %s1478_s29 = sphi %s1557_s29, %s1880_s29   ;;  %s1474_s28 = sphi %s1555_s28, %s1879_s28   ;;  %s1470_s27 = sphi %s1553_s27, %s1878_s27  }
   0xe   : > { %p60_p0 = scmp.ne.s32.totalorder %s1474_s28, %s1470_s27  ;;  %p1587_p1 = scmp.eq.s32.totalorder %s1037_s11, 0 }
   0xf   : > { %p1591_p2 = scmp.eq.s32.totalorder %s1037_s11, 1  ;;  %p218_p3 = scmp.eq.s32.totalorder %s1038_s12, 1 }
  0x10   : > { %s1860_s13 = scalar_select %p1587_p1, 1, 0 }
  0x11   : > { %p1597_p4 = por %p1587_p1, %p60_p0  ;;  %p1039_p5 = scmp.ge.s32.totalorder %s1490_s10, 1 }
  0x12   : > { %p1602_p6 = por %p218_p3, %p60_p0  ;;  %p253_p7 = scmp.lt.s32.totalorder %s1490_s10, 3 }
  0x13   : > { %s1862_s15 = scalar_select %p1597_p4, 1, 0 }
  0x14   : > { %s1863_s16 = scalar_select %p1602_p6, 1, 0 }
  0x15   : > { %p1607_p8 = pnand %p1039_p5, %p253_p7  ;;  %s1492_s18 = smov [#allocation6]  }
  0x16   : > { %s265_s19 = sshll.u32 %s1492_s18, 4  ;;  %s1493_s21 = smov [#allocation8]   ;;  %s266_s19 = int_to_ptr.vmem [resolvable:$true] %s265_s19 }
  0x17   : > { %s1864_s17 = scalar_select %p1607_p8, 1, 0 }
  0x18   : > { %p1163_p9 = pneg %p1607_p8  ;;  %s281_s22 = sshll.u32 %s1493_s21, 4  ;;  %s282_s22 = int_to_ptr.vmem [resolvable:$true] %s281_s22 }
  0x19   : > { %s1494_s23 = smov [#allocation9]   ;;  %s1277_s25 = scalar_lea.vmem %s266_s19, 256 }
  0x1a   : > { %p1616_p11 = pnand %p1163_p9, %p1587_p1  ;;  %s297_s24 = sshll.u32 %s1494_s23, 4  ;;  %s298_s24 = int_to_ptr.vmem [resolvable:$true] %s297_s24 }
  0x1b   : > { %p1278_p13 = scmp.ne.s32.totalorder %s266_s19, %s1277_s25  ;;  %p1285_p5 = scmp.lt.s32.totalorder %s266_s19, %s266_s19 }
  0x1c   : > { %p1268_p12 = pneg %p1616_p11  ;;  %p1286_p7 = scmp.lt.s32.totalorder %s1277_s25, %s1277_s25 }
  0x1e   : > { %p1280_p0 = pnand %p1278_p13, %p1268_p12  ;;  %p1287_p9 = por %p1286_p7, %p1285_p5 }
  0x20   : > { %p1281_p3 = pneg %p1280_p0 }
  0x22   : > { %p1288_p10 = pnand %p1287_p9, %p1281_p3 }
  0x24   : > { %1291 = shalt.err (!%p1288_p10)
}
  0x25   : > { %s1495_s26 = smov 64   ;;  %s1496_s11 = smov 4  }
  0x26   : > { %s1866_s1 = sld [smem:[#allocation20_spill]]  ;;  %s1303_s21 = scalar_lea.vmem %s282_s22, 256 }
  0x27   : > { %p1304_p6 = scmp.ne.s32.totalorder %s282_s22, %s1303_s21  ;;  %p1311_p1 = scmp.lt.s32.totalorder %s282_s22, %s282_s22 }
  0x28   : > { %p1312_p4 = scmp.lt.s32.totalorder %s1303_s21, %s1303_s21 }
  0x29   : > { %p1306_p13 = pnand %p1304_p6, %p1268_p12 }
  0x2a   : > { %p1313_p5 = por %p1312_p4, %p1311_p1 }
  0x2b   : > { %p1307_p0 = pneg %p1306_p13 }
  0x2c   : > { %1166 = dma.hbm_to_vmem [thread:$0]  (!%p1616_p11), %s1866_s1, 256, %s266_s19, [#allocation7], %s1495_s26, %s1495_s26, %s1496_s11  }
  0x2d   : > { %p1314_p3 = pnand %p1313_p5, %p1307_p0 }
  0x2f   : > { %1317 = shalt.err (!%p1314_p3)
}
  0x30   : > { %s1867_s3 = sld [smem:[#allocation21_spill]]  ;;  %s1329_s19 = scalar_lea.vmem %s298_s24, 256 }
  0x31   : > { %p1330_p10 = scmp.ne.s32.totalorder %s298_s24, %s1329_s19  ;;  %p1337_p9 = scmp.lt.s32.totalorder %s298_s24, %s298_s24 }
  0x32   : > { %p1338_p13 = scmp.lt.s32.totalorder %s1329_s19, %s1329_s19 }
  0x33   : > { %p1332_p7 = pnand %p1330_p10, %p1268_p12 }
  0x34   : > { %p1339_p8 = por %p1338_p13, %p1337_p9 }
  0x35   : > { %p1333_p6 = pneg %p1332_p7 }
  0x36   : > { %1169 = dma.hbm_to_vmem [thread:$0]  (!%p1616_p11), %s1867_s3, 256, %s282_s22, [#allocation7], %s1495_s26, %s1495_s26, %s1496_s11  }
  0x37   : > { %p1340_p1 = pnand %p1339_p8, %p1333_p6 }
  0x39   : > { %1343 = shalt.err (!%p1340_p1)
}
  0x3a   : > { %s1868_s5 = sld [smem:[#allocation22_spill]]  ;;  %s47_s22 = sadd.s32 1, %s1478_s29 }
  0x3b   : > { %s40_s21 = sadd.s32 1, %s1486_s9  ;;  %p54_p4 = scmp.ne.s32.totalorder %s1478_s29, %s1474_s28 }
  0x3c   : > { %p42_p8 = scmp.ge.s32.totalorder %s40_s21, 2  ;;  %p55_p12 = scmp.eq.s32.totalorder %s1490_s10, 0 }
  0x3d   : > { %p1653_p0 = por %p1591_p2, %p54_p4  ;;  %p1184_p5 = scmp.lt.s32.totalorder %s1490_s10, 2 }
  0x3e   : > { %s1884_s21 = smov (%p42_p8, %s40_s21), 0  ;;  %p56_p3 = por %p55_p12, %p54_p4 }
  0x3f   : > { %1870 = sst [smem:[#allocation19_spill]] %s1884_s21  ;;  %s314_s23 = sand.u32 1, %s1478_s29  }
  0x40   : > { %1172 = dma.hbm_to_vmem [thread:$0]  (!%p1616_p11), %s1868_s5, 256, %s298_s24, [#allocation10], %s1495_s26, %s1495_s26, %s1496_s11  }
  0x41   : > { %s44_s25 = ssub.s32 %s1486_s9, %s1884_s21  ;;  %s1044_s24 = sshll.u32 %s314_s23, 3 }
  0x42   : > { %p45_p10 = scmp.eq.s32.totalorder %s44_s25, 0  ;;  %s1045_s26 = sshll.u32 %s1486_s9, 7 }
  0x43   : > { %s323_s14 = scalar_lea.hbm %s1843_s0, %s1045_s26  ;;  %s318_s18 = scalar_lea.vmem [#allocation3], %s1044_s24 }
  0x44   : > { %s1665_s11 = scalar_select %p45_p10, %s1478_s29, %s47_s22  }
  0x45   : > { %s325_s1 = sshll.u32 %s318_s18, 4  ;;  %p1672_p2 = pnand %p1184_p5, %p56_p3  ;;  %s326_s1 = int_to_ptr.vmem [resolvable:$true] %s325_s1 }
  0x46   : > { %s315_s5 = scalar_lea.sflag [#allocation4], %s314_s23  ;;  %s1357_s25 = scalar_lea.vmem %s326_s1, 128 }
  0x47   : > { %p1346_p11 = pneg %p1672_p2  ;;  %p1358_p7 = scmp.ne.s32.totalorder %s326_s1, %s1357_s25 }
  0x48   : > { %s1497_s22 = smov [#allocation3]  }
  0x49   : > { %p1360_p6 = pnand %p1358_p7, %p1346_p11  ;;  %s1362_s21 = sshll.u32 %s1497_s22, 4  ;;  %s1363_s21 = int_to_ptr.vmem [resolvable:$false] %s1362_s21 }
  0x4a   : > { %s1364_s26 = scalar_lea.vmem %s1363_s21, 256  ;;  %p1365_p13 = scmp.lt.s32.totalorder %s326_s1, %s1363_s21 }
  0x4b   : > { %p1361_p9 = pneg %p1360_p6  ;;  %p1366_p1 = scmp.lt.s32.totalorder %s1364_s26, %s1357_s25 }
  0x4d   : > { %p1367_p4 = por %p1366_p1, %p1365_p13 }
  0x4f   : > { %p1368_p8 = pnand %p1367_p4, %p1361_p9 }
  0x51   : > { %1371 = shalt.err (!%p1368_p8)
}
  0x52   : > { %1176 = dma.hbm_to_vmem [thread:$0]  (!%p1672_p2), %s323_s14, 128, %s326_s1, %s315_s5  }
  0x53   : > { %p1872_p12 = scmp.ne.s32.totalorder %s1864_s17, 0 }
  0x54   : > { %s1683_s23 = sand.u32 (!%p1872_p12), 1, %s1474_s28   ;;  %p1873_p5 = scmp.ne.s32.totalorder (!%p1872_p12), %s1862_s15, 0 }
  0x55   : > { %334 = sbr.rel (%p1872_p12) target bundleno = 1441 (0x5a1), region = 48  ;;  %s1047_s24 = sshll.u32 (!%p1872_p12), %s1683_s23, 3 }
  0x56   : > { %s337_s19 = scalar_lea.sflag (!%p1872_p12), [#allocation4], %s1683_s23  ;;  %s340_s21 = scalar_lea.vmem (!%p1872_p12), [#allocation3], %s1047_s24 }
  0x5a   : > { %1449 = dma.done.wait (%p1873_p5), %s337_s19, 128  }
  0x5b   : > { %1451 = vsyncadd (%p1873_p5), %s337_s19, 4294967168  ;;  %p1874_p3 = scmp.ne.s32.totalorder %s1860_s13, 0 }
  0x5d   : > { %1453 = dma.done.wait (%p1874_p3), [#allocation7], 512  }
  0x5e   : > { %1455 = vsyncadd (%p1874_p3), [#allocation7], 4294966784 }
  0x5f   : > { %1457 = dma.done.wait (%p1874_p3), [#allocation10], 256  }
  0x60   : > { %1459 = vsyncadd (%p1874_p3), [#allocation10], 4294967040  ;;  %v1498_v0 = vmov 0.0   ;;  %vm1499_vm0 = vmmov 0   ;;  %v1251_v1 = vld [vmem:[#allocation8 + $0x8] sm:$0xff]   ;;  %v1252_v2 = vld [vmem:[#allocation8] sm:$0xff]  }
  0x61   : > { %1093 = vmatprep.subr.bf16.mxu0 %v1498_v0  ;;  %1097 = vmatprep.mubr.msk.bf16.mxu0 %vm1499_vm0, %v1498_v0  ;;  %v1707_v3 = vld [vmem:[%s340_s21] sm:$0xff]  ;;  %v1253_v4 = vld [vmem:[#allocation6 + $0x8] sm:$0xff]   ;;  %v1254_v5 = vld [vmem:[#allocation6] sm:$0xff]   ;;  %vm415_vm1 = vcmask 261120   ;;  %vm460_vm2 = vcmask 519168   ;;  %vm543_vm3 = vcmask 130048  }
  0x62   : > { %1101 = vmatprep.subr.bf16.mxu1 %v1498_v0  ;;  %1105 = vmatprep.mubr.msk.bf16.mxu1 %vm1499_vm0, %v1498_v0  ;;  %v391_v6 = vpack.c.bf16 %v1707_v3, %v1707_v3  ;;  %v1052_v7 = vld [vmem:[%s1847_s4] ss:$0 sm:$0xff]  ;;  %s1500_s15 = smov 112   ;;  %vm590_vm4 = vcmask 64512   ;;  %s1501_s17 = smov 96   ;;  %vm614_vm5 = vcmask 1043456  }
  0x63   : > { %1094 = vmatpush3.bf16.msra.mxu0 %v1251_v1  ;;  %1102 = vmatpush3.bf16.msra.mxu1 %v1253_v4  ;;  %v1056_v17 = vld [vmem:[%s1845_s2] ss:$0 sm:$0xff]  ;;  %s1502_s12 = smov 80   ;;  %v1256_v41 = vld [vmem:[#allocation9] sm:$0xff]   ;;  %s1071_s14 = sshll.u32 %s1482_s30, 7 }
  0x64   : > { %1095 = vmatprep.subr.bf16.mxu0 %v1498_v0  ;;  %1103 = vmatprep.subr.bf16.mxu1 %v1498_v0  ;;  %s1761_s22 = scalar_lea.hbm %s1851_s8, %s1071_s14  ;;  %s1503_s26 = smov [#allocation12]  }
  0x65   : > { %s910_s19 = sshll.u32 %s1503_s26, 4  ;;  %s911_s19 = int_to_ptr.vmem [resolvable:$true] %s910_s19 }
  0x66   : > { %s1372_s21 = scalar_lea.vmem %s911_s19, 256  ;;  %p1379_p7 = scmp.lt.s32.totalorder %s911_s19, %s911_s19 }
  0x67   : > { %1096 = vmatpush3.bf16.msra.mxu0 %v1252_v2  ;;  %1104 = vmatpush3.bf16.msra.mxu1 %v1254_v5  ;;  %v1257_v2 = vld [vmem:[#allocation9 + $0x8] sm:$0xff]   ;;  %p1373_p10 = scmp.ne.s32.totalorder %s911_s19, %s1372_s21  ;;  %p1380_p6 = scmp.lt.s32.totalorder %s1372_s21, %s1372_s21 }
  0x68   : > { %1109 = vmatprep.subr.bf16.mxu0 %v1498_v0  ;;  %1115 = vmatprep.subr.bf16.mxu1 %v1498_v0 }
  0x69   : > { %p1374_p2 = pnand %p1373_p10, %p1653_p0  ;;  %p1381_p9 = por %p1380_p6, %p1379_p7 }
  0x6a   : > { %1098 = vmatmul.mubr.msk.bf16.vlgmr.msra.gmra.mxu0 %vm415_vm1, %v391_v6  ;;  %1106 = vmatmul.mubr.msk.bf16.vlgmr.msra.gmra.mxu1 %vm415_vm1, %v391_v6 }
  0x6b   : > { %1111 = vmatprep.mubr.msk.bf16.mxu0 %vm1499_vm0, %v1498_v0  ;;  %1117 = vmatprep.mubr.msk.bf16.mxu1 %vm1499_vm0, %v1498_v0  ;;  %p1375_p11 = pneg %p1374_p2 }
  0x6d   : > { %p1382_p13 = pnand %p1381_p9, %p1375_p11 }
 0x12a   : > { %v453_v8 = vpop.f32.mrf.mxu0  ;;  %v527_v12 = vpop.f32.mrf.mxu1 }
 0x12b   : > { %v454_v9 = vadd.f32 %v1052_v7, %v453_v8  ;;  %v528_v19 = vadd.f32 %v1056_v17, %v527_v12 }
 0x12c   : > { %v1099_v10 = vpop.f32.mrf.mxu0  ;;  %v1107_v14 = vpop.f32.mrf.mxu1 }
 0x12d   : > { %v459_v11 = vpack.c.bf16 %v454_v9, %v454_v9  ;;  %v542_v23 = vpack.c.bf16 %v528_v19, %v528_v19 }
 0x12e   : > { %v456_v13 = vpop.f32.mrf.mxu0  ;;  %v530_v16 = vpop.f32.mrf.mxu1 }
 0x12f   : > { %461 = vst.msk [vmem:[#allocation2] sm:$0xf] %vm460_vm2, %v459_v11 }
 0x130   : > { %v1100_v15 = vpop.f32.mrf.mxu0  ;;  %v1108_v18 = vpop.f32.mrf.mxu1 }
 0x136   : > { %v533_v20 = vld [vmem:[#allocation2] sm:$0xf] }
 0x137   : > { %v548_v21 = vsel %vm543_vm3, %v533_v20, 0  ;;  %v1062_v22 = vcombine.low %v533_v20, %v533_v20 }
 0x138   : > { %1110 = vmatpush3.bf16.xpose.msra.mxu0 %v548_v21 }
 0x139   : > { %715 = vrot.lane.b32.xlu1 %v1062_v22, %s1500_s15  ;;  %1121 = vmatprep.subr.bf16.mxu0 %v1498_v0 }
 0x13d   : > { %713 = vrot.lane.b32.xlu1 %v542_v23, %s1500_s15 }
 0x13f   : > { %1112 = vmatmul.mubr.msk.bf16.vlgmr.msra.gmra.mxu0 %vm543_vm3, %v542_v23 }
 0x140   : > { %1123 = vmatprep.mubr.msk.bf16.mxu0 %vm1499_vm0, %v1498_v0  ;;  %1122 = vmatpush3.bf16.msra.mxu0 %v1256_v41 }
 0x141   : > { %1133 = vmatprep.subr.bf16.mxu0 %v1498_v0 }
 0x1ab   : > { %v716_v35 = vpop.permute.xlu1 %715 }
 0x1ac   : > { %v721_v37 = vsel %vm543_vm3, %v716_v35, 0 }
 0x1af   : > { %v714_v40 = vpop.permute.xlu1 %713 }
 0x1ff   : > { %v584_v24 = vpop.f32.mrf.mxu0 }
 0x200   : > { %v591_v25 = vsel %vm590_vm4, %v584_v24, -inf }
 0x201   : > { %592 = vmax.xlane.f32.xlu0 %v591_v25  ;;  %v1113_v26 = vpop.f32.mrf.mxu0 }
 0x203   : > { %v587_v27 = vpop.f32.mrf.mxu0 }
 0x205   : > { %v1114_v28 = vpop.f32.mrf.mxu0 }
 0x217   : > { %609 = vrot.lane.b32.xlu0 %v1062_v22, %s1501_s17 }
 0x28a   : > { %v593_v29 = vpop.xlane.xlu0 %592 }
 0x28b   : > { %v594_v30 = vsub.f32 %v584_v24, %v593_v29 }
 0x28d   : > { %v595_v31 = vpack.c.bf16 %v594_v30, %v594_v30 }
 0x28e   : > { %v610_v32 = vpop.permute.xlu0 %609 }
 0x28f   : > { %v597_v33 = vmul.bf16 1069105081, %v595_v31  ;;  %v616_v34 = vsel %vm614_vm5, %v610_v32, 0 }
 0x290   : > { %1116 = vmatpush3.bf16.msra.mxu1 %v616_v34 }
 0x291   : > { %1258 = vpow.bf16 %v597_v33  ;;  %1127 = vmatprep.subr.bf16.mxu1 %v1498_v0 }
 0x29f   : > { %v1259_v36 = vpop.eup %1258 }
 0x2a0   : > { %1118 = vmatmul.mubr.msk.bf16.vlgmr.msra.gmra.mxu1 %vm590_vm4, %v1259_v36  ;;  %v599_v38 = vunpack.c.l.bf16 %v1259_v36 }
 0x2a1   : > { %1128 = vmatpush3.bf16.xpose.msra.mxu1 %v721_v37  ;;  %1129 = vmatprep.mubr.msk.bf16.mxu1 %vm1499_vm0, %v1498_v0 }
 0x2a2   : > { %v600_v39 = vsel %vm590_vm4, %v599_v38, 0.0  ;;  %1139 = vmatprep.subr.bf16.mxu1 %v1498_v0 }
 0x2a3   : > { %601 = vadd.xlane.f32.xlu1 %v600_v39 }
 0x2a8   : > { %1130 = vmatmul.mubr.msk.bf16.vlgmr.msra.gmra.mxu1 %vm543_vm3, %v714_v40 }
 0x2a9   : > { %1141 = vmatprep.mubr.msk.bf16.mxu1 %vm1499_vm0, %v1498_v0  ;;  %1140 = vmatpush3.bf16.msra.mxu1 %v1257_v2 }
 0x2b4   : > { %779 = vrot.lane.b32.xlu1 %v1062_v22, %s1502_s12 }
 0x32c   : > { %v602_v42 = vpop.xlane.xlu1 %601 }
 0x32d   : > { %1260 = vrcp.f32 %v602_v42 }
 0x330   : > { %v780_v47 = vpop.permute.xlu1 %779 }
 0x331   : > { %v785_v51 = vsel %vm614_vm5, %v780_v47, 0 }
 0x33a   : > { %v1261_v43 = vpop.eup %1260 }
 0x33b   : > { %v604_v44 = vmul.f32 %v1261_v43, %v599_v38 }
 0x33d   : > { %605 = vst.msk [vmem:[#allocation12] sm:$0xff] %vm590_vm4, %v604_v44 }
 0x360   : > { %v652_v45 = vpop.f32.mrf.mxu1 }
 0x361   : > { %v658_v46 = vmul.f32 %v1261_v43, %v652_v45 }
 0x362   : > { %v1119_v48 = vpop.f32.mrf.mxu1 }
 0x363   : > { %v659_v49 = vpack.c.bf16 %v658_v46, %v658_v46 }
 0x364   : > { %v655_v50 = vpop.f32.mrf.mxu1 }
 0x365   : > { %1124 = vmatmul.mubr.msk.bf16.vlgmr.msra.gmra.mxu0 %vm543_vm3, %v659_v49 }
 0x366   : > { %1134 = vmatpush3.bf16.msra.mxu0 %v785_v51  ;;  %v1120_v52 = vpop.f32.mrf.mxu1  ;;  %1135 = vmatprep.mubr.msk.bf16.mxu0 %vm1499_vm0, %v1498_v0 }
 0x368   : > { %v757_v53 = vpop.f32.mrf.mxu1 }
 0x369   : > { %v763_v54 = vsel %vm590_vm4, %v757_v53, -inf }
 0x36a   : > { %764 = vmax.xlane.f32.xlu0 %v763_v54  ;;  %v1131_v55 = vpop.f32.mrf.mxu1 }
 0x36c   : > { %v760_v56 = vpop.f32.mrf.mxu1 }
 0x36e   : > { %v1132_v57 = vpop.f32.mrf.mxu1 }
 0x3f3   : > { %v765_v58 = vpop.xlane.xlu0 %764 }
 0x3f4   : > { %v766_v59 = vsub.f32 %v757_v53, %v765_v58 }
 0x3f6   : > { %v767_v60 = vpack.c.bf16 %v766_v59, %v766_v59 }
 0x3f8   : > { %v769_v61 = vmul.bf16 1069105081, %v767_v60 }
 0x3fa   : > { %1262 = vpow.bf16 %v769_v61 }
 0x408   : > { %v1263_v62 = vpop.eup %1262 }
 0x409   : > { %1136 = vmatmul.mubr.msk.bf16.vlgmr.msra.gmra.mxu0 %vm590_vm4, %v1263_v62  ;;  %v771_v63 = vunpack.c.l.bf16 %v1263_v62 }
 0x40b   : > { %v772_v1 = vsel %vm590_vm4, %v771_v63, 0.0 }
 0x40c   : > { %773 = vadd.xlane.f32.xlu0 %v772_v1 }
 0x425   : > { %v705_v0 = vpop.f32.mrf.mxu0 }
 0x427   : > { %v1125_v4 = vpop.f32.mrf.mxu0 }
 0x429   : > { %v708_v5 = vpop.f32.mrf.mxu0 }
 0x42b   : > { %v1126_v6 = vpop.f32.mrf.mxu0 }
 0x495   : > { %v774_v7 = vpop.xlane.xlu0 %773 }
 0x496   : > { %1264 = vrcp.f32 %v774_v7 }
 0x4a3   : > { %v1265_v8 = vpop.eup %1264 }
 0x4a4   : > { %v776_v9 = vmul.f32 %v1265_v8, %v771_v63 }
 0x4a6   : > { %778 = vst.msk [vmem:[#allocation12 + $0x8] sm:$0xff] %vm590_vm4, %v776_v9 }
 0x4c9   : > { %v821_v10 = vpop.f32.mrf.mxu0 }
 0x4ca   : > { %v827_v11 = vmul.f32 %v1265_v8, %v821_v10 }
 0x4cb   : > { %v1137_v12 = vpop.f32.mrf.mxu0 }
 0x4cc   : > { %v828_v13 = vpack.c.bf16 %v827_v11, %v827_v11 }
 0x4cd   : > { %v824_v14 = vpop.f32.mrf.mxu0 }
 0x4ce   : > { %1142 = vmatmul.mubr.msk.bf16.vlgmr.msra.gmra.mxu1 %vm543_vm3, %v828_v13 }
 0x4cf   : > { %v1138_v15 = vpop.f32.mrf.mxu0 }
 0x4d0   : > { %1385 = shalt.err (!%p1382_p13)
}
 0x4d1   : > { %s1386_s1 = scalar_lea.hbm %s1761_s22, 256  ;;  %s1390_s13 = scalar_lea.hbm %s1851_s8, 512 }
 0x4d2   : > { %p1387_p1 = scmp.ne.s32.totalorder %s1761_s22, %s1386_s1  ;;  %p1391_p12 = scmp.lt.s32.totalorder %s1761_s22, %s1851_s8 }
 0x4d3   : > { %p1392_p5 = scmp.lt.s32.totalorder %s1390_s13, %s1386_s1 }
 0x4d4   : > { %p1388_p4 = pnand %p1387_p1, %p1653_p0 }
 0x4d5   : > { %p1393_p3 = por %p1392_p5, %p1391_p12 }
 0x4d6   : > { %p1389_p8 = pneg %p1388_p4 }
 0x4d8   : > { %p1394_p10 = pnand %p1393_p3, %p1389_p8 }
 0x4da   : > { %1397 = shalt.err (!%p1394_p10)
}
 0x4db   : > { %s1504_s12 = smov 128   ;;  %s1505_s18 = smov 256   ;;  %v1060_v16 = vld [vmem:[%s1849_s6] ss:$0 sm:$0xff] }
 0x4dc   : > { %s1506_s25 = smov 8   ;;  %v541_v17 = vadd.f32 %v1060_v16, %v1707_v3  ;;  %s382_s1 = scalar_lea.vmem [#allocation11], %s1047_s24 }
 0x4dd   : > { %1160 = dma.vmem_to_hbm [thread:$0]  (%p1653_p0), %s911_s19, 256, %s1761_s22, [#allocation13], %s1504_s12, %s1505_s18, %s1506_s25  }
 0x4de   : > { %s897_s3 = sshll.u32 %s382_s1, 4  ;;  %v711_v18 = vadd.f32 %v705_v0, %v541_v17  ;;  %s1790_s15 = scalar_lea.hbm %s1850_s7, %s1071_s14  ;;  %s1792_s3 = int_to_ptr.vmem [resolvable:$true] %s897_s3 }
 0x4df   : > { %s883_s24 = scalar_lea.sflag [#allocation5], %s1683_s23  ;;  %s1398_s22 = scalar_lea.vmem %s1792_s3, 128 }
 0x4e0   : > { %p1399_p2 = scmp.ne.s32.totalorder %s1792_s3, %s1398_s22  ;;  %s1507_s30 = smov [#allocation11]  }
 0x4e1   : > { %s1402_s19 = sshll.u32 %s1507_s30, 4  ;;  %s1403_s19 = int_to_ptr.vmem [resolvable:$false] %s1402_s19 }
 0x4e2   : > { %p1400_p11 = pnand %p1399_p2, %p1653_p0  ;;  %s1404_s14 = scalar_lea.vmem %s1403_s19, 256 }
 0x4e3   : > { %p1405_p6 = scmp.lt.s32.totalorder %s1792_s3, %s1403_s19  ;;  %p1406_p9 = scmp.lt.s32.totalorder %s1404_s14, %s1398_s22 }
 0x4e4   : > { %p1401_p7 = pneg %p1400_p11 }
 0x4e5   : > { %p1407_p13 = por %p1406_p9, %p1405_p6 }
 0x4e7   : > { %p1408_p1 = pnand %p1407_p13, %p1401_p7 }
 0x58e   : > { %v874_v19 = vpop.f32.mrf.mxu1 }
 0x58f   : > { %v880_v20 = vadd.f32 %v874_v19, %v711_v18 }
 0x590   : > { %v1143_v21 = vpop.f32.mrf.mxu1 }
 0x591   : > { %881 = vst.msk [vmem:[%s382_s1] sm:$0xff] %vm415_vm1, %v880_v20 }
 0x592   : > { %v877_v3 = vpop.f32.mrf.mxu1 }
 0x593   : > { %1411 = shalt.err (!%p1408_p1)
}
 0x594   : > { %s1412_s17 = scalar_lea.hbm %s1790_s15, 128  ;;  %s1416_s18 = scalar_lea.hbm %s1850_s7, 256 }
 0x595   : > { %p1413_p4 = scmp.ne.s32.totalorder %s1790_s15, %s1412_s17  ;;  %p1417_p5 = scmp.lt.s32.totalorder %s1790_s15, %s1850_s7 }
 0x596   : > { %p1418_p3 = scmp.lt.s32.totalorder %s1416_s18, %s1412_s17 }
 0x597   : > { %p1414_p8 = pnand %p1413_p4, %p1653_p0 }
 0x598   : > { %p1419_p10 = por %p1418_p3, %p1417_p5 }
 0x599   : > { %p1415_p12 = pneg %p1414_p8 }
 0x59b   : > { %p1420_p2 = pnand %p1419_p10, %p1415_p12 }
 0x59d   : > { %1423 = shalt.err (!%p1420_p2)
}
 0x59e   : > { %1159 = dma.vmem_to_hbm [thread:$0]  (%p1653_p0), %s1792_s3, 128, %s1790_s15, %s883_s24   ;;  %v1144_v22 = vpop.f32.mrf.mxu1 }
 0x59f   : > { %1461 = dma.done.wait (%p1653_p0), [#allocation13], 256  }
 0x5a0   : > { %1463 = vsyncadd (%p1653_p0), [#allocation13], 4294967040 }
 0x5a1 PF: > { %s929_s21 = sand.u32 1, %s1470_s27   ;;  %p1875_p11 = scmp.ne.s32.totalorder %s1863_s16, 0 }
 0x5a2   : > { %p1876_p7 = scmp.ge.s32.totalorder %s1490_s10, 2  ;;  %s930_s1 = scalar_lea.sflag [#allocation5], %s929_s21 }
 0x5a4   : > { %p1178_p6 = pnand %p1876_p7, %p1875_p11 }
 0x5a6   : > { %p1179_p9 = pneg %p1178_p6 }
 0x5a8   : > { %1465 = dma.done.wait (%p1179_p9), %s930_s1, 128  }
 0x5a9   : > { %1467 = vsyncadd (%p1179_p9), %s930_s1, 4294967168  ;;  %s28_s10 = sadd.s32 1, %s1490_s10   ;;  %s1877_s20 = sld [smem:[#allocation19_spill]] }
 0x5aa   : > { %p25_p13 = scmp.ge.s32.totalorder %s28_s10, 4   ;;  %s1878_s27 = smov %s1474_s28 }
 0x5ab   : > { %s1879_s28 = smov %s1478_s29  ;;  %s1880_s29 = smov %s1665_s11 }
 0x5ac   : > { %s1881_s30 = smov %s1486_s9  ;;  %27 = sbr.rel (!%p25_p13) target bundleno = 13 (0xd), region = 120 }
 0x5af   : > { %s1882_s9 = smov %s1877_s20 }
 0x5b1   :  { %935 = vsyncpa [#allocation4], 1 }
 0x5b2   :  { %937 = vsyncpa [#allocation4 + $0x1], 1 }
 0x5b3   :  { %938 = vsyncpa [#allocation7], 1 }
 0x5b4   :  { %939 = vsyncpa [#allocation10], 1 }
 0x5b5   :  { %940 = vsyncpa [#allocation5], 1 }
 0x5b6   :  { %942 = vsyncpa [#allocation5 + $0x1], 1 }
 0x5b7   :  { %943 = vsyncpa [#allocation13], 1 }

// kernel: tpu_custom_call.1
= control target key start
LH: loop header
LB: loop body
LE: loop exit
PB: predicated region body
PF: predicated region fallthrough
CT: control target
= control target key end

     0   :  { %s1890_s0 = inlined_call_operand.hbm [shape: f32[2,8,32], index: 0, kind: input, shape index: {}]   ;;  %s1891_s1 = inlined_call_operand.hbm [shape: bf16[32,32], index: 1, kind: input, shape index: {}]   ;;  %s1892_s2 = inlined_call_operand.vmem [shape: f32[1,32], index: 2, kind: input, shape index: {}]   ;;  %s1893_s3 = inlined_call_operand.hbm [shape: bf16[32,64], index: 3, kind: input, shape index: {}]   ;;  %s1894_s4 = inlined_call_operand.vmem [shape: f32[1,64], index: 4, kind: input, shape index: {}]   ;;  %s1895_s5 = inlined_call_operand.hbm [shape: bf16[32,32], index: 5, kind: input, shape index: {}]   ;;  %s1896_s6 = inlined_call_operand.vmem [shape: f32[1,32], index: 6, kind: input, shape index: {}]   ;;  %s1897_s7 = inlined_call_operand.hbm [shape: f32[2,8,32], index: 7, kind: output, shape index: {0}]   ;;  %s1898_s8 = inlined_call_operand.hbm [shape: f32[2,2,8,8], index: 8, kind: output, shape index: {1}]  }
   0x1   :  { %1904 = sst [smem:[#allocation20_spill]] %s1891_s1 }
   0x2   :  { %1905 = sst [smem:[#allocation21_spill]] %s1893_s3 }
   0x3   :  { %1906 = sst [smem:[#allocation22_spill]] %s1895_s5 }
   0x4   :  { %14 = vsyncpa [#allocation4], 0 }
   0x5   :  { %16 = vsyncpa [#allocation4 + $0x1], 0 }
   0x6   :  { %17 = vsyncpa [#allocation7], 0 }
   0x7   :  { %18 = vsyncpa [#allocation10], 0 }
   0x8   :  { %19 = vsyncpa [#allocation5], 0 }
   0x9   :  { %21 = vsyncpa [#allocation5 + $0x1], 0 }
   0xa   :  { %22 = vsyncpa [#allocation13], 0 }
   0xb   :  { %24 = vsyncpa [#allocation13 + $0x1], 0  ;;  %s1589_s27 = smov 0   ;;  %s1591_s28 = smov 0  }
   0xc   :  { %s1593_s29 = smov 0   ;;  %s1595_s30 = smov 0  }
   0xd   :  { %s1597_s9 = smov 0   ;;  %s1599_s10 = smov 0  }
   0xe LB: > { %s1068_s11 = sadd.s32 4294967295, %s1526_s10   ;;  %s1069_s12 = sadd.s32 4294967294, %s1526_s10   ;;  %s1526_s10 = sphi %s1599_s10, %s30_s10   ;;  %s1522_s9 = sphi %s1597_s9, %s1929_s9   ;;  %s1518_s30 = sphi %s1595_s30, %s1928_s30   ;;  %s1514_s29 = sphi %s1593_s29, %s1927_s29   ;;  %s1510_s28 = sphi %s1591_s28, %s1926_s28   ;;  %s1506_s27 = sphi %s1589_s27, %s1925_s27  }
   0xf   : > { %p62_p0 = scmp.ne.s32.totalorder %s1510_s28, %s1506_s27  ;;  %p1623_p1 = scmp.eq.s32.totalorder %s1068_s11, 0 }
  0x10   : > { %p1627_p2 = scmp.eq.s32.totalorder %s1068_s11, 1  ;;  %p220_p3 = scmp.eq.s32.totalorder %s1069_s12, 1 }
  0x11   : > { %s1907_s13 = scalar_select %p1623_p1, 1, 0 }
  0x12   : > { %p1633_p4 = por %p1623_p1, %p62_p0  ;;  %p1070_p5 = scmp.ge.s32.totalorder %s1526_s10, 1 }
  0x13   : > { %p1638_p6 = por %p220_p3, %p62_p0  ;;  %p255_p7 = scmp.lt.s32.totalorder %s1526_s10, 3 }
  0x14   : > { %s1909_s15 = scalar_select %p1633_p4, 1, 0 }
  0x15   : > { %s1910_s16 = scalar_select %p1638_p6, 1, 0 }
  0x16   : > { %p1643_p8 = pnand %p1070_p5, %p255_p7  ;;  %s1528_s18 = smov [#allocation6]  }
  0x17   : > { %s267_s19 = sshll.u32 %s1528_s18, 4  ;;  %s1529_s21 = smov [#allocation8]   ;;  %s268_s19 = int_to_ptr.vmem [resolvable:$true] %s267_s19 }
  0x18   : > { %s1911_s17 = scalar_select %p1643_p8, 1, 0 }
  0x19   : > { %p1197_p9 = pneg %p1643_p8  ;;  %s283_s22 = sshll.u32 %s1529_s21, 4  ;;  %s284_s22 = int_to_ptr.vmem [resolvable:$true] %s283_s22 }
  0x1a   : > { %s1530_s23 = smov [#allocation9]   ;;  %s1313_s25 = scalar_lea.vmem %s268_s19, 256 }
  0x1b   : > { %p1652_p11 = pnand %p1197_p9, %p1623_p1  ;;  %s299_s24 = sshll.u32 %s1530_s23, 4  ;;  %s300_s24 = int_to_ptr.vmem [resolvable:$true] %s299_s24 }
  0x1c   : > { %p1314_p13 = scmp.ne.s32.totalorder %s268_s19, %s1313_s25  ;;  %p1321_p5 = scmp.lt.s32.totalorder %s268_s19, %s268_s19 }
  0x1d   : > { %p1304_p12 = pneg %p1652_p11  ;;  %p1322_p7 = scmp.lt.s32.totalorder %s1313_s25, %s1313_s25 }
  0x1f   : > { %p1316_p0 = pnand %p1314_p13, %p1304_p12  ;;  %p1323_p9 = por %p1322_p7, %p1321_p5 }
  0x21   : > { %p1317_p3 = pneg %p1316_p0 }
  0x23   : > { %p1324_p10 = pnand %p1323_p9, %p1317_p3 }
  0x25   : > { %1327 = shalt.err (!%p1324_p10)
}
  0x26   : > { %s1531_s26 = smov 64   ;;  %s1532_s11 = smov 4  }
  0x27   : > { %s1913_s1 = sld [smem:[#allocation20_spill]]  ;;  %s1339_s21 = scalar_lea.vmem %s284_s22, 256 }
  0x28   : > { %p1340_p6 = scmp.ne.s32.totalorder %s284_s22, %s1339_s21  ;;  %p1347_p1 = scmp.lt.s32.totalorder %s284_s22, %s284_s22 }
  0x29   : > { %p1348_p4 = scmp.lt.s32.totalorder %s1339_s21, %s1339_s21 }
  0x2a   : > { %p1342_p13 = pnand %p1340_p6, %p1304_p12 }
  0x2b   : > { %p1349_p5 = por %p1348_p4, %p1347_p1 }
  0x2c   : > { %p1343_p0 = pneg %p1342_p13 }
  0x2d   : > { %1200 = dma.hbm_to_vmem [thread:$0]  (!%p1652_p11), %s1913_s1, 256, %s268_s19, [#allocation7], %s1531_s26, %s1531_s26, %s1532_s11  }
  0x2e   : > { %p1350_p3 = pnand %p1349_p5, %p1343_p0 }
  0x30   : > { %1353 = shalt.err (!%p1350_p3)
}
  0x31   : > { %s1914_s3 = sld [smem:[#allocation21_spill]]  ;;  %s1365_s19 = scalar_lea.vmem %s300_s24, 256 }
  0x32   : > { %p1366_p10 = scmp.ne.s32.totalorder %s300_s24, %s1365_s19  ;;  %p1373_p9 = scmp.lt.s32.totalorder %s300_s24, %s300_s24 }
  0x33   : > { %p1374_p13 = scmp.lt.s32.totalorder %s1365_s19, %s1365_s19 }
  0x34   : > { %p1368_p7 = pnand %p1366_p10, %p1304_p12 }
  0x35   : > { %p1375_p8 = por %p1374_p13, %p1373_p9 }
  0x36   : > { %p1369_p6 = pneg %p1368_p7 }
  0x37   : > { %1203 = dma.hbm_to_vmem [thread:$0]  (!%p1652_p11), %s1914_s3, 256, %s284_s22, [#allocation7], %s1531_s26, %s1531_s26, %s1532_s11  }
  0x38   : > { %p1376_p1 = pnand %p1375_p8, %p1369_p6 }
  0x3a   : > { %1379 = shalt.err (!%p1376_p1)
}
  0x3b   : > { %s1915_s5 = sld [smem:[#allocation22_spill]]  ;;  %s49_s22 = sadd.s32 1, %s1514_s29 }
  0x3c   : > { %s42_s21 = sadd.s32 1, %s1522_s9  ;;  %p56_p4 = scmp.ne.s32.totalorder %s1514_s29, %s1510_s28 }
  0x3d   : > { %p44_p8 = scmp.ge.s32.totalorder %s42_s21, 2  ;;  %p57_p12 = scmp.eq.s32.totalorder %s1526_s10, 0 }
  0x3e   : > { %p1689_p0 = por %p1627_p2, %p56_p4  ;;  %p1221_p5 = scmp.lt.s32.totalorder %s1526_s10, 2 }
  0x3f   : > { %s1931_s21 = smov (%p44_p8, %s42_s21), 0  ;;  %p58_p3 = por %p57_p12, %p56_p4 }
  0x40   : > { %1917 = sst [smem:[#allocation19_spill]] %s1931_s21  ;;  %s316_s23 = sand.u32 1, %s1514_s29  }
  0x41   : > { %1206 = dma.hbm_to_vmem [thread:$0]  (!%p1652_p11), %s1915_s5, 256, %s300_s24, [#allocation10], %s1531_s26, %s1531_s26, %s1532_s11  }
  0x42   : > { %s46_s25 = ssub.s32 %s1522_s9, %s1931_s21  ;;  %s1075_s24 = sshll.u32 %s316_s23, 3 }
  0x43   : > { %p47_p10 = scmp.eq.s32.totalorder %s46_s25, 0  ;;  %s1076_s26 = sshll.u32 %s1522_s9, 7 }
  0x44   : > { %s325_s14 = scalar_lea.hbm %s1890_s0, %s1076_s26  ;;  %s320_s18 = scalar_lea.vmem [#allocation3], %s1075_s24 }
  0x45   : > { %s1701_s11 = scalar_select %p47_p10, %s1514_s29, %s49_s22  }
  0x46   : > { %s327_s1 = sshll.u32 %s320_s18, 4  ;;  %p1708_p2 = pnand %p1221_p5, %p58_p3  ;;  %s328_s1 = int_to_ptr.vmem [resolvable:$true] %s327_s1 }
  0x47   : > { %s317_s5 = scalar_lea.sflag [#allocation4], %s316_s23  ;;  %s1393_s25 = scalar_lea.vmem %s328_s1, 128 }
  0x48   : > { %p1382_p11 = pneg %p1708_p2  ;;  %p1394_p7 = scmp.ne.s32.totalorder %s328_s1, %s1393_s25 }
  0x49   : > { %s1533_s22 = smov [#allocation3]  }
  0x4a   : > { %p1396_p6 = pnand %p1394_p7, %p1382_p11  ;;  %s1398_s21 = sshll.u32 %s1533_s22, 4  ;;  %s1399_s21 = int_to_ptr.vmem [resolvable:$false] %s1398_s21 }
  0x4b   : > { %s1400_s26 = scalar_lea.vmem %s1399_s21, 256  ;;  %p1401_p13 = scmp.lt.s32.totalorder %s328_s1, %s1399_s21 }
  0x4c   : > { %p1397_p9 = pneg %p1396_p6  ;;  %p1402_p1 = scmp.lt.s32.totalorder %s1400_s26, %s1393_s25 }
  0x4e   : > { %p1403_p4 = por %p1402_p1, %p1401_p13 }
  0x50   : > { %p1404_p8 = pnand %p1403_p4, %p1397_p9 }
  0x52   : > { %1407 = shalt.err (!%p1404_p8)
}
  0x53   : > { %1210 = dma.hbm_to_vmem [thread:$0]  (!%p1708_p2), %s325_s14, 128, %s328_s1, %s317_s5  }
  0x54   : > { %p1919_p12 = scmp.ne.s32.totalorder %s1911_s17, 0 }
  0x55   : > { %s1719_s23 = sand.u32 (!%p1919_p12), 1, %s1510_s28   ;;  %p1920_p5 = scmp.ne.s32.totalorder (!%p1919_p12), %s1909_s15, 0 }
  0x56   : > { %336 = sbr.rel (%p1919_p12) target bundleno = 1440 (0x5a0), region = 48  ;;  %s1078_s24 = sshll.u32 (!%p1919_p12), %s1719_s23, 3 }
  0x57   : > { %s339_s19 = scalar_lea.sflag (!%p1919_p12), [#allocation4], %s1719_s23  ;;  %s342_s21 = scalar_lea.vmem (!%p1919_p12), [#allocation3], %s1078_s24 }
  0x5b   : > { %1485 = dma.done.wait (%p1920_p5), %s339_s19, 128  }
  0x5c   : > { %1487 = vsyncadd (%p1920_p5), %s339_s19, 4294967168  ;;  %p1921_p3 = scmp.ne.s32.totalorder %s1907_s13, 0 }
  0x5e   : > { %1489 = dma.done.wait (%p1921_p3), [#allocation7], 512  }
  0x5f   : > { %1491 = vsyncadd (%p1921_p3), [#allocation7], 4294966784 }
  0x60   : > { %1493 = dma.done.wait (%p1921_p3), [#allocation10], 256  }
  0x61   : > { %1495 = vsyncadd (%p1921_p3), [#allocation10], 4294967040  ;;  %v1534_v0 = vmov 0.0   ;;  %vm1535_vm0 = vmmov 0   ;;  %v1287_v1 = vld [vmem:[#allocation8 + $0x8] sm:$0xff]   ;;  %v1288_v2 = vld [vmem:[#allocation8] sm:$0xff]  }
  0x62   : > { %1127 = vmatprep.subr.bf16.mxu0 %v1534_v0  ;;  %1131 = vmatprep.mubr.msk.bf16.mxu0 %vm1535_vm0, %v1534_v0  ;;  %v1743_v3 = vld [vmem:[%s342_s21] sm:$0xff]  ;;  %v1289_v4 = vld [vmem:[#allocation6 + $0x8] sm:$0xff]   ;;  %v1290_v5 = vld [vmem:[#allocation6] sm:$0xff]   ;;  %vm422_vm1 = vcmask 261120   ;;  %vm467_vm2 = vcmask 519168   ;;  %vm550_vm3 = vcmask 130048  }
  0x63   : > { %1135 = vmatprep.subr.bf16.mxu1 %v1534_v0  ;;  %1139 = vmatprep.mubr.msk.bf16.mxu1 %vm1535_vm0, %v1534_v0  ;;  %v398_v6 = vpack.c.bf16 %v1743_v3, %v1743_v3  ;;  %v1084_v7 = vld [vmem:[%s1894_s4] ss:$0 sm:$0xff]  ;;  %s1536_s15 = smov 112   ;;  %vm597_vm4 = vcmask 64512   ;;  %s1537_s17 = smov 96   ;;  %vm621_vm5 = vcmask 1043456  }
  0x64   : > { %1128 = vmatpush3.bf16.msra.mxu0 %v1287_v1  ;;  %1136 = vmatpush3.bf16.msra.mxu1 %v1289_v4  ;;  %v1088_v17 = vld [vmem:[%s1892_s2] ss:$0 sm:$0xff]  ;;  %s1538_s12 = smov 80   ;;  %v1292_v41 = vld [vmem:[#allocation9] sm:$0xff]   ;;  %s1083_s14 = sshll.u32 %s1719_s23, 4 }
  0x65   : > { %1129 = vmatprep.subr.bf16.mxu0 %v1534_v0  ;;  %1137 = vmatprep.subr.bf16.mxu1 %v1534_v0  ;;  %s1782_s18 = scalar_lea.vmem [#allocation12], %s1083_s14  ;;  %s1105_s25 = sshll.u32 %s1518_s30, 7 }
  0x66   : > { %s1802_s19 = scalar_lea.hbm %s1898_s8, %s1105_s25  ;;  %s922_s21 = sshll.u32 %s1782_s18, 4  ;;  %s1805_s21 = int_to_ptr.vmem [resolvable:$true] %s922_s21 }
  0x67   : > { %s895_s1 = scalar_lea.sflag [#allocation13], %s1719_s23  ;;  %s1408_s3 = scalar_lea.vmem %s1805_s21, 256 }
  0x68   : > { %1130 = vmatpush3.bf16.msra.mxu0 %v1288_v2  ;;  %1138 = vmatpush3.bf16.msra.mxu1 %v1290_v5  ;;  %p1409_p10 = scmp.ne.s32.totalorder %s1805_s21, %s1408_s3  ;;  %s1539_s5 = smov [#allocation12]  }
  0x69   : > { %1143 = vmatprep.subr.bf16.mxu0 %v1534_v0  ;;  %1149 = vmatprep.subr.bf16.mxu1 %v1534_v0  ;;  %s1412_s13 = sshll.u32 %s1539_s5, 4  ;;  %s1413_s13 = int_to_ptr.vmem [resolvable:$false] %s1412_s13 }
  0x6a   : > { %p1410_p2 = pnand %p1409_p10, %p1689_p0  ;;  %p1415_p7 = scmp.lt.s32.totalorder %s1805_s21, %s1413_s13 }
  0x6b   : > { %1132 = vmatmul.mubr.msk.bf16.vlgmr.msra.gmra.mxu0 %vm422_vm1, %v398_v6  ;;  %1140 = vmatmul.mubr.msk.bf16.vlgmr.msra.gmra.mxu1 %vm422_vm1, %v398_v6 }
  0x6c   : > { %1145 = vmatprep.mubr.msk.bf16.mxu0 %vm1535_vm0, %v1534_v0  ;;  %1151 = vmatprep.mubr.msk.bf16.mxu1 %vm1535_vm0, %v1534_v0  ;;  %p1411_p11 = pneg %p1410_p2 }
 0x12b   : > { %v460_v8 = vpop.f32.mrf.mxu0  ;;  %v534_v12 = vpop.f32.mrf.mxu1 }
 0x12c   : > { %v461_v9 = vadd.f32 %v1084_v7, %v460_v8  ;;  %v535_v19 = vadd.f32 %v1088_v17, %v534_v12 }
 0x12d   : > { %v1133_v10 = vpop.f32.mrf.mxu0  ;;  %v1141_v14 = vpop.f32.mrf.mxu1 }
 0x12e   : > { %v466_v11 = vpack.c.bf16 %v461_v9, %v461_v9  ;;  %v549_v23 = vpack.c.bf16 %v535_v19, %v535_v19 }
 0x12f   : > { %v463_v13 = vpop.f32.mrf.mxu0  ;;  %v537_v16 = vpop.f32.mrf.mxu1 }
 0x130   : > { %468 = vst.msk [vmem:[#allocation2] sm:$0xf] %vm467_vm2, %v466_v11 }
 0x131   : > { %v1134_v15 = vpop.f32.mrf.mxu0  ;;  %v1142_v18 = vpop.f32.mrf.mxu1 }
 0x137   : > { %v540_v20 = vld [vmem:[#allocation2] sm:$0xf] }
 0x138   : > { %v555_v21 = vsel %vm550_vm3, %v540_v20, 0  ;;  %v1094_v22 = vcombine.low %v540_v20, %v540_v20 }
 0x139   : > { %1144 = vmatpush3.bf16.xpose.msra.mxu0 %v555_v21 }
 0x13a   : > { %722 = vrot.lane.b32.xlu1 %v1094_v22, %s1536_s15  ;;  %1155 = vmatprep.subr.bf16.mxu0 %v1534_v0 }
 0x13e   : > { %720 = vrot.lane.b32.xlu1 %v549_v23, %s1536_s15  ;;  %s1414_s15 = scalar_lea.vmem %s1413_s13, 512 }
 0x13f   : > { %p1416_p6 = scmp.lt.s32.totalorder %s1414_s15, %s1408_s3 }
 0x140   : > { %1146 = vmatmul.mubr.msk.bf16.vlgmr.msra.gmra.mxu0 %vm550_vm3, %v549_v23 }
 0x141   : > { %1157 = vmatprep.mubr.msk.bf16.mxu0 %vm1535_vm0, %v1534_v0  ;;  %1156 = vmatpush3.bf16.msra.mxu0 %v1292_v41  ;;  %p1417_p9 = por %p1416_p6, %p1415_p7 }
 0x142   : > { %1167 = vmatprep.subr.bf16.mxu0 %v1534_v0 }
 0x143   : > { %p1418_p13 = pnand %p1417_p9, %p1411_p11 }
 0x1ac   : > { %v723_v35 = vpop.permute.xlu1 %722 }
 0x1ad   : > { %v728_v37 = vsel %vm550_vm3, %v723_v35, 0 }
 0x1b0   : > { %v721_v40 = vpop.permute.xlu1 %720 }
 0x200   : > { %v591_v24 = vpop.f32.mrf.mxu0 }
 0x201   : > { %v598_v25 = vsel %vm597_vm4, %v591_v24, -inf }
 0x202   : > { %599 = vmax.xlane.f32.xlu0 %v598_v25  ;;  %v1147_v26 = vpop.f32.mrf.mxu0 }
 0x204   : > { %v594_v27 = vpop.f32.mrf.mxu0 }
 0x206   : > { %v1148_v28 = vpop.f32.mrf.mxu0 }
 0x218   : > { %616 = vrot.lane.b32.xlu0 %v1094_v22, %s1537_s17 }
 0x28b   : > { %v600_v29 = vpop.xlane.xlu0 %599 }
 0x28c   : > { %v601_v30 = vsub.f32 %v591_v24, %v600_v29 }
 0x28e   : > { %v602_v31 = vpack.c.bf16 %v601_v30, %v601_v30 }
 0x28f   : > { %v617_v32 = vpop.permute.xlu0 %616 }
 0x290   : > { %v604_v33 = vmul.bf16 1069105081, %v602_v31  ;;  %v623_v34 = vsel %vm621_vm5, %v617_v32, 0 }
 0x291   : > { %1150 = vmatpush3.bf16.msra.mxu1 %v623_v34 }
 0x292   : > { %1294 = vpow.bf16 %v604_v33  ;;  %1161 = vmatprep.subr.bf16.mxu1 %v1534_v0 }
 0x2a0   : > { %v1295_v36 = vpop.eup %1294 }
 0x2a1   : > { %1152 = vmatmul.mubr.msk.bf16.vlgmr.msra.gmra.mxu1 %vm597_vm4, %v1295_v36  ;;  %v606_v38 = vunpack.c.l.bf16 %v1295_v36 }
 0x2a2   : > { %1162 = vmatpush3.bf16.xpose.msra.mxu1 %v728_v37  ;;  %1163 = vmatprep.mubr.msk.bf16.mxu1 %vm1535_vm0, %v1534_v0 }
 0x2a3   : > { %v607_v39 = vsel %vm597_vm4, %v606_v38, 0.0  ;;  %1173 = vmatprep.subr.bf16.mxu1 %v1534_v0 }
 0x2a4   : > { %608 = vadd.xlane.f32.xlu1 %v607_v39 }
 0x2a9   : > { %1164 = vmatmul.mubr.msk.bf16.vlgmr.msra.gmra.mxu1 %vm550_vm3, %v721_v40 }
 0x2aa   : > { %1175 = vmatprep.mubr.msk.bf16.mxu1 %vm1535_vm0, %v1534_v0 }
 0x2b5   : > { %786 = vrot.lane.b32.xlu1 %v1094_v22, %s1538_s12 }
 0x32d   : > { %v609_v42 = vpop.xlane.xlu1 %608 }
 0x32e   : > { %1296 = vrcp.f32 %v609_v42 }
 0x331   : > { %v787_v47 = vpop.permute.xlu1 %786 }
 0x332   : > { %v792_v51 = vsel %vm621_vm5, %v787_v47, 0 }
 0x33b   : > { %v1297_v43 = vpop.eup %1296 }
 0x33c   : > { %v611_v44 = vmul.f32 %v1297_v43, %v606_v38 }
 0x33e   : > { %612 = vst.msk [vmem:[%s1782_s18] sm:$0xff] %vm597_vm4, %v611_v44 }
 0x361   : > { %v659_v45 = vpop.f32.mrf.mxu1 }
 0x362   : > { %v665_v46 = vmul.f32 %v1297_v43, %v659_v45 }
 0x363   : > { %v1153_v48 = vpop.f32.mrf.mxu1 }
 0x364   : > { %v666_v49 = vpack.c.bf16 %v665_v46, %v665_v46 }
 0x365   : > { %v662_v50 = vpop.f32.mrf.mxu1 }
 0x366   : > { %1158 = vmatmul.mubr.msk.bf16.vlgmr.msra.gmra.mxu0 %vm550_vm3, %v666_v49 }
 0x367   : > { %1168 = vmatpush3.bf16.msra.mxu0 %v792_v51  ;;  %v1154_v52 = vpop.f32.mrf.mxu1  ;;  %1169 = vmatprep.mubr.msk.bf16.mxu0 %vm1535_vm0, %v1534_v0  ;;  %v1293_v0 = vld [vmem:[#allocation9 + $0x8] sm:$0xff]  }
 0x368   : > { %1174 = vmatpush3.bf16.msra.mxu1 %v1293_v0 }
 0x369   : > { %v764_v53 = vpop.f32.mrf.mxu1 }
 0x36a   : > { %v770_v54 = vsel %vm597_vm4, %v764_v53, -inf }
 0x36b   : > { %771 = vmax.xlane.f32.xlu0 %v770_v54  ;;  %v1165_v55 = vpop.f32.mrf.mxu1 }
 0x36d   : > { %v767_v56 = vpop.f32.mrf.mxu1 }
 0x36f   : > { %v1166_v57 = vpop.f32.mrf.mxu1 }
 0x3f4   : > { %v772_v58 = vpop.xlane.xlu0 %771 }
 0x3f5   : > { %v773_v59 = vsub.f32 %v764_v53, %v772_v58 }
 0x3f7   : > { %v774_v60 = vpack.c.bf16 %v773_v59, %v773_v59 }
 0x3f9   : > { %v776_v61 = vmul.bf16 1069105081, %v774_v60 }
 0x3fb   : > { %1298 = vpow.bf16 %v776_v61 }
 0x409   : > { %v1299_v62 = vpop.eup %1298 }
 0x40a   : > { %1170 = vmatmul.mubr.msk.bf16.vlgmr.msra.gmra.mxu0 %vm597_vm4, %v1299_v62  ;;  %v778_v63 = vunpack.c.l.bf16 %v1299_v62 }
 0x40c   : > { %v779_v1 = vsel %vm597_vm4, %v778_v63, 0.0 }
 0x40d   : > { %780 = vadd.xlane.f32.xlu0 %v779_v1 }
 0x426   : > { %v712_v2 = vpop.f32.mrf.mxu0 }
 0x428   : > { %v1159_v4 = vpop.f32.mrf.mxu0 }
 0x42a   : > { %v715_v5 = vpop.f32.mrf.mxu0 }
 0x42c   : > { %v1160_v6 = vpop.f32.mrf.mxu0 }
 0x496   : > { %v781_v7 = vpop.xlane.xlu0 %780 }
 0x497   : > { %1300 = vrcp.f32 %v781_v7 }
 0x4a4   : > { %v1301_v8 = vpop.eup %1300 }
 0x4a5   : > { %v783_v9 = vmul.f32 %v1301_v8, %v778_v63 }
 0x4a7   : > { %1099 = vst.msk [vmem:[%s1782_s18 + $0x8] sm:$0xff] %vm597_vm4, %v783_v9 }
 0x4ca   : > { %v828_v10 = vpop.f32.mrf.mxu0 }
 0x4cb   : > { %v834_v11 = vmul.f32 %v1301_v8, %v828_v10 }
 0x4cc   : > { %v1171_v12 = vpop.f32.mrf.mxu0 }
 0x4cd   : > { %v835_v13 = vpack.c.bf16 %v834_v11, %v834_v11 }
 0x4ce   : > { %v831_v14 = vpop.f32.mrf.mxu0 }
 0x4cf   : > { %1176 = vmatmul.mubr.msk.bf16.vlgmr.msra.gmra.mxu1 %vm550_vm3, %v835_v13 }
 0x4d0   : > { %v1172_v15 = vpop.f32.mrf.mxu0 }
 0x4d1   : > { %1421 = shalt.err (!%p1418_p13)
}
 0x4d2   : > { %s1422_s17 = scalar_lea.hbm %s1802_s19, 256  ;;  %s1426_s18 = scalar_lea.hbm %s1898_s8, 512 }
 0x4d3   : > { %p1423_p1 = scmp.ne.s32.totalorder %s1802_s19, %s1422_s17  ;;  %p1427_p12 = scmp.lt.s32.totalorder %s1802_s19, %s1898_s8 }
 0x4d4   : > { %p1428_p5 = scmp.lt.s32.totalorder %s1426_s18, %s1422_s17 }
 0x4d5   : > { %p1424_p4 = pnand %p1423_p1, %p1689_p0 }
 0x4d6   : > { %p1429_p3 = por %p1428_p5, %p1427_p12 }
 0x4d7   : > { %p1425_p8 = pneg %p1424_p4 }
 0x4d9   : > { %p1430_p10 = pnand %p1429_p3, %p1425_p8 }
 0x4db   : > { %1433 = shalt.err (!%p1430_p10)
}
 0x4dc   : > { %s1540_s3 = smov 128   ;;  %s1541_s5 = smov 256   ;;  %v1092_v16 = vld [vmem:[%s1896_s6] ss:$0 sm:$0xff] }
 0x4dd   : > { %s1542_s13 = smov 8   ;;  %v548_v17 = vadd.f32 %v1092_v16, %v1743_v3  ;;  %s384_s17 = scalar_lea.vmem [#allocation11], %s1078_s24 }
 0x4de   : > { %1194 = dma.vmem_to_hbm [thread:$0]  (%p1689_p0), %s1805_s21, 256, %s1802_s19, %s895_s1, %s1540_s3, %s1541_s5, %s1542_s13  }
 0x4df   : > { %s909_s14 = sshll.u32 %s384_s17, 4  ;;  %v718_v18 = vadd.f32 %v712_v2, %v548_v17  ;;  %s1841_s26 = scalar_lea.hbm %s1897_s7, %s1105_s25  ;;  %s1843_s14 = int_to_ptr.vmem [resolvable:$true] %s909_s14 }
 0x4e0   : > { %s890_s24 = scalar_lea.sflag [#allocation5], %s1719_s23  ;;  %s1434_s19 = scalar_lea.vmem %s1843_s14, 128 }
 0x4e1   : > { %p1435_p2 = scmp.ne.s32.totalorder %s1843_s14, %s1434_s19  ;;  %s1543_s30 = smov [#allocation11]  }
 0x4e2   : > { %s1438_s21 = sshll.u32 %s1543_s30, 4  ;;  %s1439_s21 = int_to_ptr.vmem [resolvable:$false] %s1438_s21 }
 0x4e3   : > { %p1436_p11 = pnand %p1435_p2, %p1689_p0  ;;  %s1440_s25 = scalar_lea.vmem %s1439_s21, 256 }
 0x4e4   : > { %p1441_p6 = scmp.lt.s32.totalorder %s1843_s14, %s1439_s21  ;;  %p1442_p9 = scmp.lt.s32.totalorder %s1440_s25, %s1434_s19 }
 0x4e5   : > { %p1437_p7 = pneg %p1436_p11 }
 0x4e6   : > { %p1443_p13 = por %p1442_p9, %p1441_p6 }
 0x4e8   : > { %p1444_p1 = pnand %p1443_p13, %p1437_p7 }
 0x58f   : > { %v881_v19 = vpop.f32.mrf.mxu1 }
 0x590   : > { %v887_v20 = vadd.f32 %v881_v19, %v718_v18 }
 0x591   : > { %v1177_v21 = vpop.f32.mrf.mxu1 }
 0x592   : > { %888 = vst.msk [vmem:[%s384_s17] sm:$0xff] %vm422_vm1, %v887_v20 }
 0x593   : > { %v884_v3 = vpop.f32.mrf.mxu1 }
 0x594   : > { %1447 = shalt.err (!%p1444_p1)
}
 0x595   : > { %s1448_s1 = scalar_lea.hbm %s1841_s26, 128  ;;  %s1452_s5 = scalar_lea.hbm %s1897_s7, 256 }
 0x596   : > { %p1449_p4 = scmp.ne.s32.totalorder %s1841_s26, %s1448_s1  ;;  %p1453_p5 = scmp.lt.s32.totalorder %s1841_s26, %s1897_s7 }
 0x597   : > { %p1454_p3 = scmp.lt.s32.totalorder %s1452_s5, %s1448_s1 }
 0x598   : > { %p1450_p8 = pnand %p1449_p4, %p1689_p0 }
 0x599   : > { %p1455_p10 = por %p1454_p3, %p1453_p5 }
 0x59a   : > { %p1451_p12 = pneg %p1450_p8 }
 0x59c   : > { %p1456_p2 = pnand %p1455_p10, %p1451_p12 }
 0x59e   : > { %1459 = shalt.err (!%p1456_p2)
}
 0x59f   : > { %1193 = dma.vmem_to_hbm [thread:$0]  (%p1689_p0), %s1843_s14, 128, %s1841_s26, %s890_s24   ;;  %v1178_v22 = vpop.f32.mrf.mxu1 }
 0x5a0 PF: > { %s937_s12 = sand.u32 1, %s1506_s27   ;;  %p1922_p11 = scmp.ne.s32.totalorder %s1910_s16, 0 }
 0x5a1   : > { %p1923_p7 = scmp.ge.s32.totalorder %s1526_s10, 2  ;;  %s938_s17 = scalar_lea.sflag [#allocation5], %s937_s12 }
 0x5a3   : > { %p1212_p6 = pnand %p1923_p7, %p1922_p11 }
 0x5a5   : > { %p1213_p9 = pneg %p1212_p6 }
 0x5a7   : > { %1497 = dma.done.wait (%p1213_p9), %s938_s17, 128  }
 0x5a8   : > { %1499 = vsyncadd (%p1213_p9), %s938_s17, 4294967168  ;;  %s947_s18 = scalar_lea.sflag [#allocation13], %s937_s12 }
 0x5a9   : > { %1501 = dma.done.wait (%p1213_p9), %s947_s18, 256  }
 0x5aa   : > { %1503 = vsyncadd (%p1213_p9), %s947_s18, 4294967040  ;;  %s30_s10 = sadd.s32 1, %s1526_s10   ;;  %s1924_s20 = sld [smem:[#allocation19_spill]] }
 0x5ab   : > { %p27_p13 = scmp.ge.s32.totalorder %s30_s10, 4   ;;  %s1925_s27 = smov %s1510_s28 }
 0x5ac   : > { %s1926_s28 = smov %s1514_s29  ;;  %s1927_s29 = smov %s1701_s11 }
 0x5ad   : > { %s1928_s30 = smov %s1522_s9  ;;  %29 = sbr.rel (!%p27_p13) target bundleno = 14 (0xe), region = 128 }
 0x5b0   : > { %s1929_s9 = smov %s1924_s20 }
 0x5b2   :  { %952 = vsyncpa [#allocation4], 1 }
 0x5b3   :  { %954 = vsyncpa [#allocation4 + $0x1], 1 }
 0x5b4   :  { %955 = vsyncpa [#allocation7], 1 }
 0x5b5   :  { %956 = vsyncpa [#allocation10], 1 }
 0x5b6   :  { %957 = vsyncpa [#allocation5], 1 }
 0x5b7   :  { %959 = vsyncpa [#allocation5 + $0x1], 1 }
 0x5b8   :  { %960 = vsyncpa [#allocation13], 1 }
 0x5b9   :  { %962 = vsyncpa [#allocation13 + $0x1], 1 }

</bundles_post_ra>
